<compile_context>
chip_gen: v7x
topology: tpu7x:2x2x1
jax: 0.10.0
libtpu: 0.0.40
codegen_flags: <defaults>
</compile_context>

<pallas_src>
import math

import jax
import jax.numpy as jnp
from jax.experimental import pallas as pl
from jax.experimental.pallas import tpu as pltpu

E = 10                         # d_model == emb_dim (forward requires emb_dim == 10)
H = 5                          # nhead
DH = E // H                    # per-head dim
FF = 50                        # dim_feedforward
SQRT_HIDDEN = math.sqrt(50.0)  # PositionalEncoding.hidden_size == 50
LN_EPS = 1e-5
MAX_SEQ = 50
SLAB_W = 64                    # slab lane width (max param width is FF=50)


# ----------------------------------------------------------------------------
# Parameter slab layout: one (rows, 64) f32 array.
#   * multi-row weight matrices start at 8-row-aligned rows
#   * 1-row vectors (biases, LN gamma/beta) are packed one-per-row, densely
# ----------------------------------------------------------------------------
def _param_entries():
    entries = []

    def mha(p):
        entries.extend([(p + "_wqkv", E, 3 * E), (p + "_bqkv", 1, 3 * E),
                        (p + "_wo", E, E), (p + "_bo", 1, E)])

    def ffn(p):
        entries.extend([(p + "_l1w", E, FF), (p + "_l1b", 1, FF),
                        (p + "_l2w", FF, E), (p + "_l2b", 1, E)])

    def ln(p):
        entries.extend([(p + "_w", 1, E), (p + "_b", 1, E)])

    mha("enc_sa"); ln("enc_n1"); ffn("enc_ff"); ln("enc_n2"); ln("enc_final")
    mha("dec_sa"); ln("dec_n1"); mha("dec_ca"); ln("dec_n2")
    ffn("dec_ff"); ln("dec_n3"); ln("dec_final")
    entries.extend([("fc_w", E, E), ("fc_b", 1, E)])
    return entries


def _round_up(x, m):
    return (x + m - 1) // m * m


def _param_offsets():
    entries = _param_entries()
    offsets = {}
    row = 0
    # matrices first, 8-row-aligned starts
    for name, rows, cols in entries:
        if rows > 1:
            offsets[name] = (row, 0, rows, cols)
            row = _round_up(row + rows, 8)
    # 1-row vectors, packed densely (one per row, lane 0)
    for name, rows, cols in entries:
        if rows == 1:
            offsets[name] = (row, 0, 1, cols)
            row += 1
    return offsets, _round_up(row, 8)


def pack_params(pdict):
    offsets, total_rows = _param_offsets()
    slab = jnp.zeros((total_rows, SLAB_W), jnp.float32)
    for name, (r0, c0, rows, cols) in offsets.items():
        a = jnp.asarray(pdict[name], jnp.float32).reshape(rows, cols)
        slab = slab.at[r0:r0 + rows, c0:c0 + cols].set(a)
    return slab


# ----------------------------------------------------------------------------
# Deterministic parameter initialization (layout-equivalent to the PyTorch
# module; weights are random since no checkpoint is provided).
# ----------------------------------------------------------------------------
def init_params(key):
    keys = iter(jax.random.split(key, 64))
    nk = lambda: next(keys)
    qscale = 1.0 / math.sqrt(DH)
    p = {}

    def w(shape, fan_in):
        return jax.random.normal(nk(), shape, jnp.float32) / math.sqrt(fan_in)

    def b(shape):
        return jax.random.normal(nk(), shape, jnp.float32) * 0.01

    def mha(pref):
        wq = w((E, E), E) * qscale     # 1/sqrt(DH) query scale folded in
        bq = b((1, E)) * qscale
        wk = w((E, E), E); bk = b((1, E))
        wv = w((E, E), E); bv = b((1, E))
        p[pref + "_wqkv"] = jnp.concatenate([wq, wk, wv], axis=1)   # (E, 3E)
        p[pref + "_bqkv"] = jnp.concatenate([bq, bk, bv], axis=1)   # (1, 3E)
        p[pref + "_wo"] = w((E, E), E); p[pref + "_bo"] = b((1, E))

    def ffn(pref):
        p[pref + "_l1w"] = w((E, FF), E);  p[pref + "_l1b"] = b((1, FF))
        p[pref + "_l2w"] = w((FF, E), FF); p[pref + "_l2b"] = b((1, E))

    def ln(pref):
        p[pref + "_w"] = jnp.ones((1, E), jnp.float32)
        p[pref + "_b"] = jnp.zeros((1, E), jnp.float32)

    mha("enc_sa"); ln("enc_n1"); ffn("enc_ff"); ln("enc_n2"); ln("enc_final")
    mha("dec_sa"); ln("dec_n1"); mha("dec_ca"); ln("dec_n2")
    ffn("dec_ff"); ln("dec_n3"); ln("dec_final")
    p["fc_w"] = w((E, E), E); p["fc_b"] = b((1, E))

    # PositionalEncoding buffer (exactly as in the reference module)
    position = jnp.arange(MAX_SEQ, dtype=jnp.float32)[:, None]
    div_term = jnp.exp(jnp.arange(0, E, 2, dtype=jnp.float32) * (-math.log(10000.0) / 50.0))
    pe = jnp.zeros((MAX_SEQ, E), jnp.float32)
    pe = pe.at[:, 0::2].set(jnp.sin(position * div_term))
    pe = pe.at[:, 1::2].set(jnp.cos(position * div_term))

    return {"pe": pe, "slab": pack_params(p)}


# ----------------------------------------------------------------------------
# Kernel: one grid step == one batch sample (L, E).  No attention mask needed.
# ----------------------------------------------------------------------------
def _make_kernel(offsets):
    def kernel(x_ref, pe_ref, slab_ref, out_ref):
        # lazy parameter access: static slice of the packed slab at point of use
        def getp(name):
            r0, c0, rows, cols = offsets[name]
            return slab_ref[r0:r0 + rows, c0:c0 + cols]

        def linear(x, w, bias):
            return jnp.dot(x, w, preferred_element_type=jnp.float32) + bias

        def layer_norm(x, pref):
            mu = jnp.mean(x, axis=-1, keepdims=True)
            xc = x - mu
            var = jnp.mean(xc * xc, axis=-1, keepdims=True)
            return xc * jax.lax.rsqrt(var + LN_EPS) * getp(pref + "_w") + getp(pref + "_b")

        def attend(q, k, v, pref):
            kT = k.T                                   # one XLU transpose per block
            wo = getp(pref + "_wo")
            out = None
            for h in range(H):
                lo = h * DH
                s = jnp.dot(q[:, lo:lo + DH], kT[lo:lo + DH, :],
                            preferred_element_type=jnp.float32)          # (L, L)
                s = s - jnp.max(s, axis=-1, keepdims=True)
                pr = jnp.exp(s)
                pr = pr * pl.reciprocal(jnp.sum(pr, axis=-1, keepdims=True), approx=True)
                oh = jnp.dot(pr, v[:, lo:lo + DH],
                             preferred_element_type=jnp.float32)          # (L, DH)
                # per-head output projection (replaces the 5-way lane concat)
                contrib = jnp.dot(oh, wo[lo:lo + DH, :],
                                  preferred_element_type=jnp.float32)     # (L, E)
                out = contrib if out is None else out + contrib
            return out + getp(pref + "_bo")

        def self_attn(x_in, pref):
            # fused Q|K|V: one (L,E)x(E,3E) matmul + one bias add
            qkv = linear(x_in, getp(pref + "_wqkv"), getp(pref + "_bqkv"))
            return attend(qkv[:, 0:E], qkv[:, E:2 * E], qkv[:, 2 * E:3 * E], pref)

        def cross_attn(q_in, kv_in, pref):
            wqkv = getp(pref + "_wqkv"); bqkv = getp(pref + "_bqkv")
            q = jnp.dot(q_in, wqkv[:, 0:E],
                        preferred_element_type=jnp.float32) + bqkv[:, 0:E]
            kv = jnp.dot(kv_in, wqkv[:, E:3 * E],
                         preferred_element_type=jnp.float32) + bqkv[:, E:3 * E]
            return attend(q, kv[:, 0:E], kv[:, E:2 * E], pref)

        def ffn(x, pref):
            h1 = jnp.maximum(linear(x, getp(pref + "_l1w"), getp(pref + "_l1b")), 0.0)
            return linear(h1, getp(pref + "_l2w"), getp(pref + "_l2b"))

        # --- PositionalEncoding: x * sqrt(50) + pe[batch_index] ---
        x = x_ref[0] * SQRT_HIDDEN + pe_ref[0]                    # (L, E)

        # --- encoder layer (post-norm, relu, dropout=identity) + final norm ---
        src = layer_norm(x + self_attn(x, "enc_sa"), "enc_n1")
        src = layer_norm(src + ffn(src, "enc_ff"), "enc_n2")
        memory = layer_norm(src, "enc_final")

        # --- decoder layer (self-attn, cross-attn, ffn) + final norm ---
        tgt = layer_norm(x + self_attn(x, "dec_sa"), "dec_n1")
        tgt = layer_norm(tgt + cross_attn(tgt, memory, "dec_ca"), "dec_n2")
        tgt = layer_norm(tgt + ffn(tgt, "dec_ff"), "dec_n3")
        dec = layer_norm(tgt, "dec_final")

        # --- Generatore.fc ---
        out_ref[0] = linear(dec, getp("fc_w"), getp("fc_b"))

    return kernel


# ----------------------------------------------------------------------------
# Wrapper
# ----------------------------------------------------------------------------
def generatore_forward(input_seq, params):
    L, N, Ein = input_seq.shape
    assert Ein == E, "emb_dim must equal d_model=10"
    assert N <= MAX_SEQ, "reference PE is indexed by the batch axis; requires N <= 50"

    # batch-major (N, L, E); each grid step handles one sample
    x = jnp.transpose(input_seq, (1, 0, 2)).astype(jnp.float32)
    # reference PE adds pe[:, :x.size(1), :] i.e. indexed by the *batch* axis
    pe_n = params["pe"][:N].reshape(N, 1, E).astype(jnp.float32)
    slab = params["slab"]

    offsets, _ = _param_offsets()
    kernel = _make_kernel(offsets)

    out = pl.pallas_call(
        kernel,
        out_shape=jax.ShapeDtypeStruct((N, L, E), jnp.float32),
        grid=(N,),
        in_specs=[
            pl.BlockSpec((1, L, E), lambda n: (n, 0, 0)),
            pl.BlockSpec((1, 1, E), lambda n: (n, 0, 0)),
            pl.BlockSpec(slab.shape, lambda n: (0, 0)),   # resident across steps
        ],
        out_specs=pl.BlockSpec((1, L, E), lambda n: (n, 0, 0)),
        compiler_params=pltpu.CompilerParams(dimension_semantics=("parallel",)),
    )(x, pe_n, slab)
    return out.transpose(1, 0, 2)


if __name__ == "__main__":
    key = jax.random.PRNGKey(0)
    pkey, xkey = jax.random.split(key)
    params = init_params(pkey)
    L, N = 8, 2                      # seq_len=8, batch=2, emb_dim=10
    input_seq = jax.random.normal(xkey, (L, N, E), jnp.float32)
    out = generatore_forward(input_seq, params)
    jax.block_until_ready(out)
    assert out.shape == (L, N, E) and out.dtype == jnp.float32
    print("KERNEL_OK")
</pallas_src>

<mosaic_0001>
module attributes {stable_mosaic.version = 11 : i64} {
  func.func @kernel(%arg0: i32, %arg1: memref<1x8x10xf32, #tpu.memory_space<vmem>>, %arg2: memref<1x1x10xf32, #tpu.memory_space<vmem>>, %arg3: memref<288x64xf32, #tpu.memory_space<vmem>>, %arg4: memref<1x8x10xf32, #tpu.memory_space<vmem>>) attributes {dimension_semantics = [#tpu.dimension_semantics<parallel>], iteration_bounds = array<i64: 2>, scalar_prefetch = 0 : i64, scratch_operands = 0 : i64, tpu.core_type = #tpu.core_type<tc>, window_params = [{transform_indices = @transform_0, window_bounds = array<i64: 1, 8, 10>}, {transform_indices = @transform_1, window_bounds = array<i64: 1, 1, 10>}, {pipeline_mode = #tpu.pipeline_mode<synchronous>, transform_indices = @transform_2, window_bounds = array<i64: 288, 64>}, {transform_indices = @transform_3, window_bounds = array<i64: 1, 8, 10>}]} {
    %c0 = arith.constant 0 : index
    %c0_0 = arith.constant 0 : index
    %c0_1 = arith.constant 0 : index
    %0 = vector.load %arg1[%c0, %c0_0, %c0_1] : memref<1x8x10xf32, #tpu.memory_space<vmem>>, vector<1x8x10xf32>
    %1 = vector.shape_cast %0 : vector<1x8x10xf32> to vector<8x10xf32>
    %cst = arith.constant 7.07106781 : f32
    %2 = vector.broadcast %cst : f32 to vector<8x10xf32>
    %3 = arith.mulf %1, %2 : vector<8x10xf32>
    %c0_2 = arith.constant 0 : index
    %c0_3 = arith.constant 0 : index
    %c0_4 = arith.constant 0 : index
    %4 = vector.load %arg2[%c0_2, %c0_3, %c0_4] : memref<1x1x10xf32, #tpu.memory_space<vmem>>, vector<1x1x10xf32>
    %5 = vector.shape_cast %4 : vector<1x1x10xf32> to vector<1x10xf32>
    %6 = vector.broadcast %5 : vector<1x10xf32> to vector<8x10xf32>
    %7 = arith.addf %3, %6 : vector<8x10xf32>
    %c0_5 = arith.constant 0 : index
    %c0_6 = arith.constant 0 : index
    %8 = vector.load %arg3[%c0_5, %c0_6] : memref<288x64xf32, #tpu.memory_space<vmem>>, vector<10x30xf32>
    %c256 = arith.constant 256 : index
    %c0_7 = arith.constant 0 : index
    %9 = vector.load %arg3[%c256, %c0_7] : memref<288x64xf32, #tpu.memory_space<vmem>>, vector<1x30xf32>
    %cst_8 = arith.constant dense<0.000000e+00> : vector<8x30xf32>
    %10 = tpu.matmul %7, %8, %cst_8 {dimension_numbers = #tpu.dot_dimension_numbers<[1], [0], [0], [1], [0, 0, 1, 1], [], []>} : vector<8x10xf32>, vector<10x30xf32>, vector<8x30xf32> -> vector<8x30xf32>
    %11 = vector.broadcast %9 : vector<1x30xf32> to vector<8x30xf32>
    %12 = arith.addf %10, %11 : vector<8x30xf32>
    %13 = vector.extract_strided_slice %12 {offsets = [0, 0], sizes = [8, 10], strides = [1, 1]} : vector<8x30xf32> to vector<8x10xf32>
    %14 = vector.extract_strided_slice %12 {offsets = [0, 10], sizes = [8, 10], strides = [1, 1]} : vector<8x30xf32> to vector<8x10xf32>
    %15 = vector.extract_strided_slice %12 {offsets = [0, 20], sizes = [8, 10], strides = [1, 1]} : vector<8x30xf32> to vector<8x10xf32>
    %16 = tpu.transpose %14, [1, 0] : vector<8x10xf32> -> vector<10x8xf32>
    %c16 = arith.constant 16 : index
    %c0_9 = arith.constant 0 : index
    %17 = vector.load %arg3[%c16, %c0_9] : memref<288x64xf32, #tpu.memory_space<vmem>>, vector<10x10xf32>
    %18 = vector.extract_strided_slice %13 {offsets = [0, 0], sizes = [8, 2], strides = [1, 1]} : vector<8x10xf32> to vector<8x2xf32>
    %19 = vector.extract_strided_slice %16 {offsets = [0, 0], sizes = [2, 8], strides = [1, 1]} : vector<10x8xf32> to vector<2x8xf32>
    %cst_10 = arith.constant dense<0.000000e+00> : vector<8x8xf32>
    %20 = tpu.matmul %18, %19, %cst_10 {dimension_numbers = #tpu.dot_dimension_numbers<[1], [0], [0], [1], [0, 0, 1, 1], [], []>} : vector<8x2xf32>, vector<2x8xf32>, vector<8x8xf32> -> vector<8x8xf32>
    %cst_11 = arith.constant dense<0xFF800000> : vector<8xf32>
    %21 = vector.multi_reduction <maximumf>, %20, %cst_11 [1] : vector<8x8xf32> to vector<8xf32>
    %22 = vector.shape_cast %21 : vector<8xf32> to vector<8x1xf32>
    %23 = vector.broadcast %22 : vector<8x1xf32> to vector<8x8xf32>
    %24 = arith.subf %20, %23 : vector<8x8xf32>
    %25 = math.exp %24 : vector<8x8xf32>
    %cst_12 = arith.constant dense<0.000000e+00> : vector<8xf32>
    %26 = vector.multi_reduction <add>, %25, %cst_12 [1] : vector<8x8xf32> to vector<8xf32>
    %27 = vector.shape_cast %26 : vector<8xf32> to vector<8x1xf32>
    %28 = tpu.reciprocal %27 {approx = true} : vector<8x1xf32> -> vector<8x1xf32>
    %29 = vector.broadcast %28 : vector<8x1xf32> to vector<8x8xf32>
    %30 = arith.mulf %25, %29 : vector<8x8xf32>
    %31 = vector.extract_strided_slice %15 {offsets = [0, 0], sizes = [8, 2], strides = [1, 1]} : vector<8x10xf32> to vector<8x2xf32>
    %cst_13 = arith.constant dense<0.000000e+00> : vector<8x2xf32>
    %32 = tpu.matmul %30, %31, %cst_13 {dimension_numbers = #tpu.dot_dimension_numbers<[1], [0], [0], [1], [0, 0, 1, 1], [], []>} : vector<8x8xf32>, vector<8x2xf32>, vector<8x2xf32> -> vector<8x2xf32>
    %33 = vector.extract_strided_slice %17 {offsets = [0, 0], sizes = [2, 10], strides = [1, 1]} : vector<10x10xf32> to vector<2x10xf32>
    %cst_14 = arith.constant dense<0.000000e+00> : vector<8x10xf32>
    %34 = tpu.matmul %32, %33, %cst_14 {dimension_numbers = #tpu.dot_dimension_numbers<[1], [0], [0], [1], [0, 0, 1, 1], [], []>} : vector<8x2xf32>, vector<2x10xf32>, vector<8x10xf32> -> vector<8x10xf32>
    %35 = vector.extract_strided_slice %13 {offsets = [0, 2], sizes = [8, 2], strides = [1, 1]} : vector<8x10xf32> to vector<8x2xf32>
    %36 = vector.extract_strided_slice %16 {offsets = [2, 0], sizes = [2, 8], strides = [1, 1]} : vector<10x8xf32> to vector<2x8xf32>
    %cst_15 = arith.constant dense<0.000000e+00> : vector<8x8xf32>
    %37 = tpu.matmul %35, %36, %cst_15 {dimension_numbers = #tpu.dot_dimension_numbers<[1], [0], [0], [1], [0, 0, 1, 1], [], []>} : vector<8x2xf32>, vector<2x8xf32>, vector<8x8xf32> -> vector<8x8xf32>
    %cst_16 = arith.constant dense<0xFF800000> : vector<8xf32>
    %38 = vector.multi_reduction <maximumf>, %37, %cst_16 [1] : vector<8x8xf32> to vector<8xf32>
    %39 = vector.shape_cast %38 : vector<8xf32> to vector<8x1xf32>
    %40 = vector.broadcast %39 : vector<8x1xf32> to vector<8x8xf32>
    %41 = arith.subf %37, %40 : vector<8x8xf32>
    %42 = math.exp %41 : vector<8x8xf32>
    %cst_17 = arith.constant dense<0.000000e+00> : vector<8xf32>
    %43 = vector.multi_reduction <add>, %42, %cst_17 [1] : vector<8x8xf32> to vector<8xf32>
    %44 = vector.shape_cast %43 : vector<8xf32> to vector<8x1xf32>
    %45 = tpu.reciprocal %44 {approx = true} : vector<8x1xf32> -> vector<8x1xf32>
    %46 = vector.broadcast %45 : vector<8x1xf32> to vector<8x8xf32>
    %47 = arith.mulf %42, %46 : vector<8x8xf32>
    %48 = vector.extract_strided_slice %15 {offsets = [0, 2], sizes = [8, 2], strides = [1, 1]} : vector<8x10xf32> to vector<8x2xf32>
    %cst_18 = arith.constant dense<0.000000e+00> : vector<8x2xf32>
    %49 = tpu.matmul %47, %48, %cst_18 {dimension_numbers = #tpu.dot_dimension_numbers<[1], [0], [0], [1], [0, 0, 1, 1], [], []>} : vector<8x8xf32>, vector<8x2xf32>, vector<8x2xf32> -> vector<8x2xf32>
    %50 = vector.extract_strided_slice %17 {offsets = [2, 0], sizes = [2, 10], strides = [1, 1]} : vector<10x10xf32> to vector<2x10xf32>
    %cst_19 = arith.constant dense<0.000000e+00> : vector<8x10xf32>
    %51 = tpu.matmul %49, %50, %cst_19 {dimension_numbers = #tpu.dot_dimension_numbers<[1], [0], [0], [1], [0, 0, 1, 1], [], []>} : vector<8x2xf32>, vector<2x10xf32>, vector<8x10xf32> -> vector<8x10xf32>
    %52 = arith.addf %34, %51 : vector<8x10xf32>
    %53 = vector.extract_strided_slice %13 {offsets = [0, 4], sizes = [8, 2], strides = [1, 1]} : vector<8x10xf32> to vector<8x2xf32>
    %54 = vector.extract_strided_slice %16 {offsets = [4, 0], sizes = [2, 8], strides = [1, 1]} : vector<10x8xf32> to vector<2x8xf32>
    %cst_20 = arith.constant dense<0.000000e+00> : vector<8x8xf32>
    %55 = tpu.matmul %53, %54, %cst_20 {dimension_numbers = #tpu.dot_dimension_numbers<[1], [0], [0], [1], [0, 0, 1, 1], [], []>} : vector<8x2xf32>, vector<2x8xf32>, vector<8x8xf32> -> vector<8x8xf32>
    %cst_21 = arith.constant dense<0xFF800000> : vector<8xf32>
    %56 = vector.multi_reduction <maximumf>, %55, %cst_21 [1] : vector<8x8xf32> to vector<8xf32>
    %57 = vector.shape_cast %56 : vector<8xf32> to vector<8x1xf32>
    %58 = vector.broadcast %57 : vector<8x1xf32> to vector<8x8xf32>
    %59 = arith.subf %55, %58 : vector<8x8xf32>
    %60 = math.exp %59 : vector<8x8xf32>
    %cst_22 = arith.constant dense<0.000000e+00> : vector<8xf32>
    %61 = vector.multi_reduction <add>, %60, %cst_22 [1] : vector<8x8xf32> to vector<8xf32>
    %62 = vector.shape_cast %61 : vector<8xf32> to vector<8x1xf32>
    %63 = tpu.reciprocal %62 {approx = true} : vector<8x1xf32> -> vector<8x1xf32>
    %64 = vector.broadcast %63 : vector<8x1xf32> to vector<8x8xf32>
    %65 = arith.mulf %60, %64 : vector<8x8xf32>
    %66 = vector.extract_strided_slice %15 {offsets = [0, 4], sizes = [8, 2], strides = [1, 1]} : vector<8x10xf32> to vector<8x2xf32>
    %cst_23 = arith.constant dense<0.000000e+00> : vector<8x2xf32>
    %67 = tpu.matmul %65, %66, %cst_23 {dimension_numbers = #tpu.dot_dimension_numbers<[1], [0], [0], [1], [0, 0, 1, 1], [], []>} : vector<8x8xf32>, vector<8x2xf32>, vector<8x2xf32> -> vector<8x2xf32>
    %68 = vector.extract_strided_slice %17 {offsets = [4, 0], sizes = [2, 10], strides = [1, 1]} : vector<10x10xf32> to vector<2x10xf32>
    %cst_24 = arith.constant dense<0.000000e+00> : vector<8x10xf32>
    %69 = tpu.matmul %67, %68, %cst_24 {dimension_numbers = #tpu.dot_dimension_numbers<[1], [0], [0], [1], [0, 0, 1, 1], [], []>} : vector<8x2xf32>, vector<2x10xf32>, vector<8x10xf32> -> vector<8x10xf32>
    %70 = arith.addf %52, %69 : vector<8x10xf32>
    %71 = vector.extract_strided_slice %13 {offsets = [0, 6], sizes = [8, 2], strides = [1, 1]} : vector<8x10xf32> to vector<8x2xf32>
    %72 = vector.extract_strided_slice %16 {offsets = [6, 0], sizes = [2, 8], strides = [1, 1]} : vector<10x8xf32> to vector<2x8xf32>
    %cst_25 = arith.constant dense<0.000000e+00> : vector<8x8xf32>
    %73 = tpu.matmul %71, %72, %cst_25 {dimension_numbers = #tpu.dot_dimension_numbers<[1], [0], [0], [1], [0, 0, 1, 1], [], []>} : vector<8x2xf32>, vector<2x8xf32>, vector<8x8xf32> -> vector<8x8xf32>
    %cst_26 = arith.constant dense<0xFF800000> : vector<8xf32>
    %74 = vector.multi_reduction <maximumf>, %73, %cst_26 [1] : vector<8x8xf32> to vector<8xf32>
    %75 = vector.shape_cast %74 : vector<8xf32> to vector<8x1xf32>
    %76 = vector.broadcast %75 : vector<8x1xf32> to vector<8x8xf32>
    %77 = arith.subf %73, %76 : vector<8x8xf32>
    %78 = math.exp %77 : vector<8x8xf32>
    %cst_27 = arith.constant dense<0.000000e+00> : vector<8xf32>
    %79 = vector.multi_reduction <add>, %78, %cst_27 [1] : vector<8x8xf32> to vector<8xf32>
    %80 = vector.shape_cast %79 : vector<8xf32> to vector<8x1xf32>
    %81 = tpu.reciprocal %80 {approx = true} : vector<8x1xf32> -> vector<8x1xf32>
    %82 = vector.broadcast %81 : vector<8x1xf32> to vector<8x8xf32>
    %83 = arith.mulf %78, %82 : vector<8x8xf32>
    %84 = vector.extract_strided_slice %15 {offsets = [0, 6], sizes = [8, 2], strides = [1, 1]} : vector<8x10xf32> to vector<8x2xf32>
    %cst_28 = arith.constant dense<0.000000e+00> : vector<8x2xf32>
    %85 = tpu.matmul %83, %84, %cst_28 {dimension_numbers = #tpu.dot_dimension_numbers<[1], [0], [0], [1], [0, 0, 1, 1], [], []>} : vector<8x8xf32>, vector<8x2xf32>, vector<8x2xf32> -> vector<8x2xf32>
    %86 = vector.extract_strided_slice %17 {offsets = [6, 0], sizes = [2, 10], strides = [1, 1]} : vector<10x10xf32> to vector<2x10xf32>
    %cst_29 = arith.constant dense<0.000000e+00> : vector<8x10xf32>
    %87 = tpu.matmul %85, %86, %cst_29 {dimension_numbers = #tpu.dot_dimension_numbers<[1], [0], [0], [1], [0, 0, 1, 1], [], []>} : vector<8x2xf32>, vector<2x10xf32>, vector<8x10xf32> -> vector<8x10xf32>
    %88 = arith.addf %70, %87 : vector<8x10xf32>
    %89 = vector.extract_strided_slice %13 {offsets = [0, 8], sizes = [8, 2], strides = [1, 1]} : vector<8x10xf32> to vector<8x2xf32>
    %90 = vector.extract_strided_slice %16 {offsets = [8, 0], sizes = [2, 8], strides = [1, 1]} : vector<10x8xf32> to vector<2x8xf32>
    %cst_30 = arith.constant dense<0.000000e+00> : vector<8x8xf32>
    %91 = tpu.matmul %89, %90, %cst_30 {dimension_numbers = #tpu.dot_dimension_numbers<[1], [0], [0], [1], [0, 0, 1, 1], [], []>} : vector<8x2xf32>, vector<2x8xf32>, vector<8x8xf32> -> vector<8x8xf32>
    %cst_31 = arith.constant dense<0xFF800000> : vector<8xf32>
    %92 = vector.multi_reduction <maximumf>, %91, %cst_31 [1] : vector<8x8xf32> to vector<8xf32>
    %93 = vector.shape_cast %92 : vector<8xf32> to vector<8x1xf32>
    %94 = vector.broadcast %93 : vector<8x1xf32> to vector<8x8xf32>
    %95 = arith.subf %91, %94 : vector<8x8xf32>
    %96 = math.exp %95 : vector<8x8xf32>
    %cst_32 = arith.constant dense<0.000000e+00> : vector<8xf32>
    %97 = vector.multi_reduction <add>, %96, %cst_32 [1] : vector<8x8xf32> to vector<8xf32>
    %98 = vector.shape_cast %97 : vector<8xf32> to vector<8x1xf32>
    %99 = tpu.reciprocal %98 {approx = true} : vector<8x1xf32> -> vector<8x1xf32>
    %100 = vector.broadcast %99 : vector<8x1xf32> to vector<8x8xf32>
    %101 = arith.mulf %96, %100 : vector<8x8xf32>
    %102 = vector.extract_strided_slice %15 {offsets = [0, 8], sizes = [8, 2], strides = [1, 1]} : vector<8x10xf32> to vector<8x2xf32>
    %cst_33 = arith.constant dense<0.000000e+00> : vector<8x2xf32>
    %103 = tpu.matmul %101, %102, %cst_33 {dimension_numbers = #tpu.dot_dimension_numbers<[1], [0], [0], [1], [0, 0, 1, 1], [], []>} : vector<8x8xf32>, vector<8x2xf32>, vector<8x2xf32> -> vector<8x2xf32>
    %104 = vector.extract_strided_slice %17 {offsets = [8, 0], sizes = [2, 10], strides = [1, 1]} : vector<10x10xf32> to vector<2x10xf32>
    %cst_34 = arith.constant dense<0.000000e+00> : vector<8x10xf32>
    %105 = tpu.matmul %103, %104, %cst_34 {dimension_numbers = #tpu.dot_dimension_numbers<[1], [0], [0], [1], [0, 0, 1, 1], [], []>} : vector<8x2xf32>, vector<2x10xf32>, vector<8x10xf32> -> vector<8x10xf32>
    %106 = arith.addf %88, %105 : vector<8x10xf32>
    %c257 = arith.constant 257 : index
    %c0_35 = arith.constant 0 : index
    %107 = vector.load %arg3[%c257, %c0_35] : memref<288x64xf32, #tpu.memory_space<vmem>>, vector<1x10xf32>
    %108 = vector.broadcast %107 : vector<1x10xf32> to vector<8x10xf32>
    %109 = arith.addf %106, %108 : vector<8x10xf32>
    %110 = arith.addf %7, %109 : vector<8x10xf32>
    %cst_36 = arith.constant dense<0.000000e+00> : vector<8xf32>
    %111 = vector.multi_reduction <add>, %110, %cst_36 [1] : vector<8x10xf32> to vector<8xf32>
    %112 = vector.shape_cast %111 : vector<8xf32> to vector<8x1xf32>
    %cst_37 = arith.constant 1.000000e+01 : f32
    %113 = vector.broadcast %cst_37 : f32 to vector<8x1xf32>
    %114 = arith.divf %112, %113 : vector<8x1xf32>
    %115 = vector.broadcast %114 : vector<8x1xf32> to vector<8x10xf32>
    %116 = arith.subf %110, %115 : vector<8x10xf32>
    %117 = arith.mulf %116, %116 : vector<8x10xf32>
    %cst_38 = arith.constant dense<0.000000e+00> : vector<8xf32>
    %118 = vector.multi_reduction <add>, %117, %cst_38 [1] : vector<8x10xf32> to vector<8xf32>
    %119 = vector.shape_cast %118 : vector<8xf32> to vector<8x1xf32>
    %cst_39 = arith.constant 1.000000e+01 : f32
    %120 = vector.broadcast %cst_39 : f32 to vector<8x1xf32>
    %121 = arith.divf %119, %120 : vector<8x1xf32>
    %cst_40 = arith.constant 9.99999974E-6 : f32
    %122 = vector.broadcast %cst_40 : f32 to vector<8x1xf32>
    %123 = arith.addf %121, %122 : vector<8x1xf32>
    %124 = math.rsqrt %123 : vector<8x1xf32>
    %125 = vector.broadcast %124 : vector<8x1xf32> to vector<8x10xf32>
    %126 = arith.mulf %116, %125 : vector<8x10xf32>
    %c258 = arith.constant 258 : index
    %c0_41 = arith.constant 0 : index
    %127 = vector.load %arg3[%c258, %c0_41] : memref<288x64xf32, #tpu.memory_space<vmem>>, vector<1x10xf32>
    %128 = vector.broadcast %127 : vector<1x10xf32> to vector<8x10xf32>
    %129 = arith.mulf %126, %128 : vector<8x10xf32>
    %c259 = arith.constant 259 : index
    %c0_42 = arith.constant 0 : index
    %130 = vector.load %arg3[%c259, %c0_42] : memref<288x64xf32, #tpu.memory_space<vmem>>, vector<1x10xf32>
    %131 = vector.broadcast %130 : vector<1x10xf32> to vector<8x10xf32>
    %132 = arith.addf %129, %131 : vector<8x10xf32>
    %c32 = arith.constant 32 : index
    %c0_43 = arith.constant 0 : index
    %133 = vector.load %arg3[%c32, %c0_43] : memref<288x64xf32, #tpu.memory_space<vmem>>, vector<10x50xf32>
    %c260 = arith.constant 260 : index
    %c0_44 = arith.constant 0 : index
    %134 = vector.load %arg3[%c260, %c0_44] : memref<288x64xf32, #tpu.memory_space<vmem>>, vector<1x50xf32>
    %cst_45 = arith.constant dense<0.000000e+00> : vector<8x50xf32>
    %135 = tpu.matmul %132, %133, %cst_45 {dimension_numbers = #tpu.dot_dimension_numbers<[1], [0], [0], [1], [0, 0, 1, 1], [], []>} : vector<8x10xf32>, vector<10x50xf32>, vector<8x50xf32> -> vector<8x50xf32>
    %136 = vector.broadcast %134 : vector<1x50xf32> to vector<8x50xf32>
    %137 = arith.addf %135, %136 : vector<8x50xf32>
    %cst_46 = arith.constant 0.000000e+00 : f32
    %138 = vector.broadcast %cst_46 : f32 to vector<8x50xf32>
    %139 = arith.maximumf %137, %138 : vector<8x50xf32>
    %c48 = arith.constant 48 : index
    %c0_47 = arith.constant 0 : index
    %140 = vector.load %arg3[%c48, %c0_47] : memref<288x64xf32, #tpu.memory_space<vmem>>, vector<50x10xf32>
    %c261 = arith.constant 261 : index
    %c0_48 = arith.constant 0 : index
    %141 = vector.load %arg3[%c261, %c0_48] : memref<288x64xf32, #tpu.memory_space<vmem>>, vector<1x10xf32>
    %cst_49 = arith.constant dense<0.000000e+00> : vector<8x10xf32>
    %142 = tpu.matmul %139, %140, %cst_49 {dimension_numbers = #tpu.dot_dimension_numbers<[1], [0], [0], [1], [0, 0, 1, 1], [], []>} : vector<8x50xf32>, vector<50x10xf32>, vector<8x10xf32> -> vector<8x10xf32>
    %143 = vector.broadcast %141 : vector<1x10xf32> to vector<8x10xf32>
    %144 = arith.addf %142, %143 : vector<8x10xf32>
    %145 = arith.addf %132, %144 : vector<8x10xf32>
    %cst_50 = arith.constant dense<0.000000e+00> : vector<8xf32>
    %146 = vector.multi_reduction <add>, %145, %cst_50 [1] : vector<8x10xf32> to vector<8xf32>
    %147 = vector.shape_cast %146 : vector<8xf32> to vector<8x1xf32>
    %cst_51 = arith.constant 1.000000e+01 : f32
    %148 = vector.broadcast %cst_51 : f32 to vector<8x1xf32>
    %149 = arith.divf %147, %148 : vector<8x1xf32>
    %150 = vector.broadcast %149 : vector<8x1xf32> to vector<8x10xf32>
    %151 = arith.subf %145, %150 : vector<8x10xf32>
    %152 = arith.mulf %151, %151 : vector<8x10xf32>
    %cst_52 = arith.constant dense<0.000000e+00> : vector<8xf32>
    %153 = vector.multi_reduction <add>, %152, %cst_52 [1] : vector<8x10xf32> to vector<8xf32>
    %154 = vector.shape_cast %153 : vector<8xf32> to vector<8x1xf32>
    %cst_53 = arith.constant 1.000000e+01 : f32
    %155 = vector.broadcast %cst_53 : f32 to vector<8x1xf32>
    %156 = arith.divf %154, %155 : vector<8x1xf32>
    %cst_54 = arith.constant 9.99999974E-6 : f32
    %157 = vector.broadcast %cst_54 : f32 to vector<8x1xf32>
    %158 = arith.addf %156, %157 : vector<8x1xf32>
    %159 = math.rsqrt %158 : vector<8x1xf32>
    %160 = vector.broadcast %159 : vector<8x1xf32> to vector<8x10xf32>
    %161 = arith.mulf %151, %160 : vector<8x10xf32>
    %c262 = arith.constant 262 : index
    %c0_55 = arith.constant 0 : index
    %162 = vector.load %arg3[%c262, %c0_55] : memref<288x64xf32, #tpu.memory_space<vmem>>, vector<1x10xf32>
    %163 = vector.broadcast %162 : vector<1x10xf32> to vector<8x10xf32>
    %164 = arith.mulf %161, %163 : vector<8x10xf32>
    %c263 = arith.constant 263 : index
    %c0_56 = arith.constant 0 : index
    %165 = vector.load %arg3[%c263, %c0_56] : memref<288x64xf32, #tpu.memory_space<vmem>>, vector<1x10xf32>
    %166 = vector.broadcast %165 : vector<1x10xf32> to vector<8x10xf32>
    %167 = arith.addf %164, %166 : vector<8x10xf32>
    %cst_57 = arith.constant dense<0.000000e+00> : vector<8xf32>
    %168 = vector.multi_reduction <add>, %167, %cst_57 [1] : vector<8x10xf32> to vector<8xf32>
    %169 = vector.shape_cast %168 : vector<8xf32> to vector<8x1xf32>
    %cst_58 = arith.constant 1.000000e+01 : f32
    %170 = vector.broadcast %cst_58 : f32 to vector<8x1xf32>
    %171 = arith.divf %169, %170 : vector<8x1xf32>
    %172 = vector.broadcast %171 : vector<8x1xf32> to vector<8x10xf32>
    %173 = arith.subf %167, %172 : vector<8x10xf32>
    %174 = arith.mulf %173, %173 : vector<8x10xf32>
    %cst_59 = arith.constant dense<0.000000e+00> : vector<8xf32>
    %175 = vector.multi_reduction <add>, %174, %cst_59 [1] : vector<8x10xf32> to vector<8xf32>
    %176 = vector.shape_cast %175 : vector<8xf32> to vector<8x1xf32>
    %cst_60 = arith.constant 1.000000e+01 : f32
    %177 = vector.broadcast %cst_60 : f32 to vector<8x1xf32>
    %178 = arith.divf %176, %177 : vector<8x1xf32>
    %cst_61 = arith.constant 9.99999974E-6 : f32
    %179 = vector.broadcast %cst_61 : f32 to vector<8x1xf32>
    %180 = arith.addf %178, %179 : vector<8x1xf32>
    %181 = math.rsqrt %180 : vector<8x1xf32>
    %182 = vector.broadcast %181 : vector<8x1xf32> to vector<8x10xf32>
    %183 = arith.mulf %173, %182 : vector<8x10xf32>
    %c264 = arith.constant 264 : index
    %c0_62 = arith.constant 0 : index
    %184 = vector.load %arg3[%c264, %c0_62] : memref<288x64xf32, #tpu.memory_space<vmem>>, vector<1x10xf32>
    %185 = vector.broadcast %184 : vector<1x10xf32> to vector<8x10xf32>
    %186 = arith.mulf %183, %185 : vector<8x10xf32>
    %c265 = arith.constant 265 : index
    %c0_63 = arith.constant 0 : index
    %187 = vector.load %arg3[%c265, %c0_63] : memref<288x64xf32, #tpu.memory_space<vmem>>, vector<1x10xf32>
    %188 = vector.broadcast %187 : vector<1x10xf32> to vector<8x10xf32>
    %189 = arith.addf %186, %188 : vector<8x10xf32>
    %c104 = arith.constant 104 : index
    %c0_64 = arith.constant 0 : index
    %190 = vector.load %arg3[%c104, %c0_64] : memref<288x64xf32, #tpu.memory_space<vmem>>, vector<10x30xf32>
    %c266 = arith.constant 266 : index
    %c0_65 = arith.constant 0 : index
    %191 = vector.load %arg3[%c266, %c0_65] : memref<288x64xf32, #tpu.memory_space<vmem>>, vector<1x30xf32>
    %cst_66 = arith.constant dense<0.000000e+00> : vector<8x30xf32>
    %192 = tpu.matmul %7, %190, %cst_66 {dimension_numbers = #tpu.dot_dimension_numbers<[1], [0], [0], [1], [0, 0, 1, 1], [], []>} : vector<8x10xf32>, vector<10x30xf32>, vector<8x30xf32> -> vector<8x30xf32>
    %193 = vector.broadcast %191 : vector<1x30xf32> to vector<8x30xf32>
    %194 = arith.addf %192, %193 : vector<8x30xf32>
    %195 = vector.extract_strided_slice %194 {offsets = [0, 0], sizes = [8, 10], strides = [1, 1]} : vector<8x30xf32> to vector<8x10xf32>
    %196 = vector.extract_strided_slice %194 {offsets = [0, 10], sizes = [8, 10], strides = [1, 1]} : vector<8x30xf32> to vector<8x10xf32>
    %197 = vector.extract_strided_slice %194 {offsets = [0, 20], sizes = [8, 10], strides = [1, 1]} : vector<8x30xf32> to vector<8x10xf32>
    %198 = tpu.transpose %196, [1, 0] : vector<8x10xf32> -> vector<10x8xf32>
    %c120 = arith.constant 120 : index
    %c0_67 = arith.constant 0 : index
    %199 = vector.load %arg3[%c120, %c0_67] : memref<288x64xf32, #tpu.memory_space<vmem>>, vector<10x10xf32>
    %200 = vector.extract_strided_slice %195 {offsets = [0, 0], sizes = [8, 2], strides = [1, 1]} : vector<8x10xf32> to vector<8x2xf32>
    %201 = vector.extract_strided_slice %198 {offsets = [0, 0], sizes = [2, 8], strides = [1, 1]} : vector<10x8xf32> to vector<2x8xf32>
    %cst_68 = arith.constant dense<0.000000e+00> : vector<8x8xf32>
    %202 = tpu.matmul %200, %201, %cst_68 {dimension_numbers = #tpu.dot_dimension_numbers<[1], [0], [0], [1], [0, 0, 1, 1], [], []>} : vector<8x2xf32>, vector<2x8xf32>, vector<8x8xf32> -> vector<8x8xf32>
    %cst_69 = arith.constant dense<0xFF800000> : vector<8xf32>
    %203 = vector.multi_reduction <maximumf>, %202, %cst_69 [1] : vector<8x8xf32> to vector<8xf32>
    %204 = vector.shape_cast %203 : vector<8xf32> to vector<8x1xf32>
    %205 = vector.broadcast %204 : vector<8x1xf32> to vector<8x8xf32>
    %206 = arith.subf %202, %205 : vector<8x8xf32>
    %207 = math.exp %206 : vector<8x8xf32>
    %cst_70 = arith.constant dense<0.000000e+00> : vector<8xf32>
    %208 = vector.multi_reduction <add>, %207, %cst_70 [1] : vector<8x8xf32> to vector<8xf32>
    %209 = vector.shape_cast %208 : vector<8xf32> to vector<8x1xf32>
    %210 = tpu.reciprocal %209 {approx = true} : vector<8x1xf32> -> vector<8x1xf32>
    %211 = vector.broadcast %210 : vector<8x1xf32> to vector<8x8xf32>
    %212 = arith.mulf %207, %211 : vector<8x8xf32>
    %213 = vector.extract_strided_slice %197 {offsets = [0, 0], sizes = [8, 2], strides = [1, 1]} : vector<8x10xf32> to vector<8x2xf32>
    %cst_71 = arith.constant dense<0.000000e+00> : vector<8x2xf32>
    %214 = tpu.matmul %212, %213, %cst_71 {dimension_numbers = #tpu.dot_dimension_numbers<[1], [0], [0], [1], [0, 0, 1, 1], [], []>} : vector<8x8xf32>, vector<8x2xf32>, vector<8x2xf32> -> vector<8x2xf32>
    %215 = vector.extract_strided_slice %199 {offsets = [0, 0], sizes = [2, 10], strides = [1, 1]} : vector<10x10xf32> to vector<2x10xf32>
    %cst_72 = arith.constant dense<0.000000e+00> : vector<8x10xf32>
    %216 = tpu.matmul %214, %215, %cst_72 {dimension_numbers = #tpu.dot_dimension_numbers<[1], [0], [0], [1], [0, 0, 1, 1], [], []>} : vector<8x2xf32>, vector<2x10xf32>, vector<8x10xf32> -> vector<8x10xf32>
    %217 = vector.extract_strided_slice %195 {offsets = [0, 2], sizes = [8, 2], strides = [1, 1]} : vector<8x10xf32> to vector<8x2xf32>
    %218 = vector.extract_strided_slice %198 {offsets = [2, 0], sizes = [2, 8], strides = [1, 1]} : vector<10x8xf32> to vector<2x8xf32>
    %cst_73 = arith.constant dense<0.000000e+00> : vector<8x8xf32>
    %219 = tpu.matmul %217, %218, %cst_73 {dimension_numbers = #tpu.dot_dimension_numbers<[1], [0], [0], [1], [0, 0, 1, 1], [], []>} : vector<8x2xf32>, vector<2x8xf32>, vector<8x8xf32> -> vector<8x8xf32>
    %cst_74 = arith.constant dense<0xFF800000> : vector<8xf32>
    %220 = vector.multi_reduction <maximumf>, %219, %cst_74 [1] : vector<8x8xf32> to vector<8xf32>
    %221 = vector.shape_cast %220 : vector<8xf32> to vector<8x1xf32>
    %222 = vector.broadcast %221 : vector<8x1xf32> to vector<8x8xf32>
    %223 = arith.subf %219, %222 : vector<8x8xf32>
    %224 = math.exp %223 : vector<8x8xf32>
    %cst_75 = arith.constant dense<0.000000e+00> : vector<8xf32>
    %225 = vector.multi_reduction <add>, %224, %cst_75 [1] : vector<8x8xf32> to vector<8xf32>
    %226 = vector.shape_cast %225 : vector<8xf32> to vector<8x1xf32>
    %227 = tpu.reciprocal %226 {approx = true} : vector<8x1xf32> -> vector<8x1xf32>
    %228 = vector.broadcast %227 : vector<8x1xf32> to vector<8x8xf32>
    %229 = arith.mulf %224, %228 : vector<8x8xf32>
    %230 = vector.extract_strided_slice %197 {offsets = [0, 2], sizes = [8, 2], strides = [1, 1]} : vector<8x10xf32> to vector<8x2xf32>
    %cst_76 = arith.constant dense<0.000000e+00> : vector<8x2xf32>
    %231 = tpu.matmul %229, %230, %cst_76 {dimension_numbers = #tpu.dot_dimension_numbers<[1], [0], [0], [1], [0, 0, 1, 1], [], []>} : vector<8x8xf32>, vector<8x2xf32>, vector<8x2xf32> -> vector<8x2xf32>
    %232 = vector.extract_strided_slice %199 {offsets = [2, 0], sizes = [2, 10], strides = [1, 1]} : vector<10x10xf32> to vector<2x10xf32>
    %cst_77 = arith.constant dense<0.000000e+00> : vector<8x10xf32>
    %233 = tpu.matmul %231, %232, %cst_77 {dimension_numbers = #tpu.dot_dimension_numbers<[1], [0], [0], [1], [0, 0, 1, 1], [], []>} : vector<8x2xf32>, vector<2x10xf32>, vector<8x10xf32> -> vector<8x10xf32>
    %234 = arith.addf %216, %233 : vector<8x10xf32>
    %235 = vector.extract_strided_slice %195 {offsets = [0, 4], sizes = [8, 2], strides = [1, 1]} : vector<8x10xf32> to vector<8x2xf32>
    %236 = vector.extract_strided_slice %198 {offsets = [4, 0], sizes = [2, 8], strides = [1, 1]} : vector<10x8xf32> to vector<2x8xf32>
    %cst_78 = arith.constant dense<0.000000e+00> : vector<8x8xf32>
    %237 = tpu.matmul %235, %236, %cst_78 {dimension_numbers = #tpu.dot_dimension_numbers<[1], [0], [0], [1], [0, 0, 1, 1], [], []>} : vector<8x2xf32>, vector<2x8xf32>, vector<8x8xf32> -> vector<8x8xf32>
    %cst_79 = arith.constant dense<0xFF800000> : vector<8xf32>
    %238 = vector.multi_reduction <maximumf>, %237, %cst_79 [1] : vector<8x8xf32> to vector<8xf32>
    %239 = vector.shape_cast %238 : vector<8xf32> to vector<8x1xf32>
    %240 = vector.broadcast %239 : vector<8x1xf32> to vector<8x8xf32>
    %241 = arith.subf %237, %240 : vector<8x8xf32>
    %242 = math.exp %241 : vector<8x8xf32>
    %cst_80 = arith.constant dense<0.000000e+00> : vector<8xf32>
    %243 = vector.multi_reduction <add>, %242, %cst_80 [1] : vector<8x8xf32> to vector<8xf32>
    %244 = vector.shape_cast %243 : vector<8xf32> to vector<8x1xf32>
    %245 = tpu.reciprocal %244 {approx = true} : vector<8x1xf32> -> vector<8x1xf32>
    %246 = vector.broadcast %245 : vector<8x1xf32> to vector<8x8xf32>
    %247 = arith.mulf %242, %246 : vector<8x8xf32>
    %248 = vector.extract_strided_slice %197 {offsets = [0, 4], sizes = [8, 2], strides = [1, 1]} : vector<8x10xf32> to vector<8x2xf32>
    %cst_81 = arith.constant dense<0.000000e+00> : vector<8x2xf32>
    %249 = tpu.matmul %247, %248, %cst_81 {dimension_numbers = #tpu.dot_dimension_numbers<[1], [0], [0], [1], [0, 0, 1, 1], [], []>} : vector<8x8xf32>, vector<8x2xf32>, vector<8x2xf32> -> vector<8x2xf32>
    %250 = vector.extract_strided_slice %199 {offsets = [4, 0], sizes = [2, 10], strides = [1, 1]} : vector<10x10xf32> to vector<2x10xf32>
    %cst_82 = arith.constant dense<0.000000e+00> : vector<8x10xf32>
    %251 = tpu.matmul %249, %250, %cst_82 {dimension_numbers = #tpu.dot_dimension_numbers<[1], [0], [0], [1], [0, 0, 1, 1], [], []>} : vector<8x2xf32>, vector<2x10xf32>, vector<8x10xf32> -> vector<8x10xf32>
    %252 = arith.addf %234, %251 : vector<8x10xf32>
    %253 = vector.extract_strided_slice %195 {offsets = [0, 6], sizes = [8, 2], strides = [1, 1]} : vector<8x10xf32> to vector<8x2xf32>
    %254 = vector.extract_strided_slice %198 {offsets = [6, 0], sizes = [2, 8], strides = [1, 1]} : vector<10x8xf32> to vector<2x8xf32>
    %cst_83 = arith.constant dense<0.000000e+00> : vector<8x8xf32>
    %255 = tpu.matmul %253, %254, %cst_83 {dimension_numbers = #tpu.dot_dimension_numbers<[1], [0], [0], [1], [0, 0, 1, 1], [], []>} : vector<8x2xf32>, vector<2x8xf32>, vector<8x8xf32> -> vector<8x8xf32>
    %cst_84 = arith.constant dense<0xFF800000> : vector<8xf32>
    %256 = vector.multi_reduction <maximumf>, %255, %cst_84 [1] : vector<8x8xf32> to vector<8xf32>
    %257 = vector.shape_cast %256 : vector<8xf32> to vector<8x1xf32>
    %258 = vector.broadcast %257 : vector<8x1xf32> to vector<8x8xf32>
    %259 = arith.subf %255, %258 : vector<8x8xf32>
    %260 = math.exp %259 : vector<8x8xf32>
    %cst_85 = arith.constant dense<0.000000e+00> : vector<8xf32>
    %261 = vector.multi_reduction <add>, %260, %cst_85 [1] : vector<8x8xf32> to vector<8xf32>
    %262 = vector.shape_cast %261 : vector<8xf32> to vector<8x1xf32>
    %263 = tpu.reciprocal %262 {approx = true} : vector<8x1xf32> -> vector<8x1xf32>
    %264 = vector.broadcast %263 : vector<8x1xf32> to vector<8x8xf32>
    %265 = arith.mulf %260, %264 : vector<8x8xf32>
    %266 = vector.extract_strided_slice %197 {offsets = [0, 6], sizes = [8, 2], strides = [1, 1]} : vector<8x10xf32> to vector<8x2xf32>
    %cst_86 = arith.constant dense<0.000000e+00> : vector<8x2xf32>
    %267 = tpu.matmul %265, %266, %cst_86 {dimension_numbers = #tpu.dot_dimension_numbers<[1], [0], [0], [1], [0, 0, 1, 1], [], []>} : vector<8x8xf32>, vector<8x2xf32>, vector<8x2xf32> -> vector<8x2xf32>
    %268 = vector.extract_strided_slice %199 {offsets = [6, 0], sizes = [2, 10], strides = [1, 1]} : vector<10x10xf32> to vector<2x10xf32>
    %cst_87 = arith.constant dense<0.000000e+00> : vector<8x10xf32>
    %269 = tpu.matmul %267, %268, %cst_87 {dimension_numbers = #tpu.dot_dimension_numbers<[1], [0], [0], [1], [0, 0, 1, 1], [], []>} : vector<8x2xf32>, vector<2x10xf32>, vector<8x10xf32> -> vector<8x10xf32>
    %270 = arith.addf %252, %269 : vector<8x10xf32>
    %271 = vector.extract_strided_slice %195 {offsets = [0, 8], sizes = [8, 2], strides = [1, 1]} : vector<8x10xf32> to vector<8x2xf32>
    %272 = vector.extract_strided_slice %198 {offsets = [8, 0], sizes = [2, 8], strides = [1, 1]} : vector<10x8xf32> to vector<2x8xf32>
    %cst_88 = arith.constant dense<0.000000e+00> : vector<8x8xf32>
    %273 = tpu.matmul %271, %272, %cst_88 {dimension_numbers = #tpu.dot_dimension_numbers<[1], [0], [0], [1], [0, 0, 1, 1], [], []>} : vector<8x2xf32>, vector<2x8xf32>, vector<8x8xf32> -> vector<8x8xf32>
    %cst_89 = arith.constant dense<0xFF800000> : vector<8xf32>
    %274 = vector.multi_reduction <maximumf>, %273, %cst_89 [1] : vector<8x8xf32> to vector<8xf32>
    %275 = vector.shape_cast %274 : vector<8xf32> to vector<8x1xf32>
    %276 = vector.broadcast %275 : vector<8x1xf32> to vector<8x8xf32>
    %277 = arith.subf %273, %276 : vector<8x8xf32>
    %278 = math.exp %277 : vector<8x8xf32>
    %cst_90 = arith.constant dense<0.000000e+00> : vector<8xf32>
    %279 = vector.multi_reduction <add>, %278, %cst_90 [1] : vector<8x8xf32> to vector<8xf32>
    %280 = vector.shape_cast %279 : vector<8xf32> to vector<8x1xf32>
    %281 = tpu.reciprocal %280 {approx = true} : vector<8x1xf32> -> vector<8x1xf32>
    %282 = vector.broadcast %281 : vector<8x1xf32> to vector<8x8xf32>
    %283 = arith.mulf %278, %282 : vector<8x8xf32>
    %284 = vector.extract_strided_slice %197 {offsets = [0, 8], sizes = [8, 2], strides = [1, 1]} : vector<8x10xf32> to vector<8x2xf32>
    %cst_91 = arith.constant dense<0.000000e+00> : vector<8x2xf32>
    %285 = tpu.matmul %283, %284, %cst_91 {dimension_numbers = #tpu.dot_dimension_numbers<[1], [0], [0], [1], [0, 0, 1, 1], [], []>} : vector<8x8xf32>, vector<8x2xf32>, vector<8x2xf32> -> vector<8x2xf32>
    %286 = vector.extract_strided_slice %199 {offsets = [8, 0], sizes = [2, 10], strides = [1, 1]} : vector<10x10xf32> to vector<2x10xf32>
    %cst_92 = arith.constant dense<0.000000e+00> : vector<8x10xf32>
    %287 = tpu.matmul %285, %286, %cst_92 {dimension_numbers = #tpu.dot_dimension_numbers<[1], [0], [0], [1], [0, 0, 1, 1], [], []>} : vector<8x2xf32>, vector<2x10xf32>, vector<8x10xf32> -> vector<8x10xf32>
    %288 = arith.addf %270, %287 : vector<8x10xf32>
    %c267 = arith.constant 267 : index
    %c0_93 = arith.constant 0 : index
    %289 = vector.load %arg3[%c267, %c0_93] : memref<288x64xf32, #tpu.memory_space<vmem>>, vector<1x10xf32>
    %290 = vector.broadcast %289 : vector<1x10xf32> to vector<8x10xf32>
    %291 = arith.addf %288, %290 : vector<8x10xf32>
    %292 = arith.addf %7, %291 : vector<8x10xf32>
    %cst_94 = arith.constant dense<0.000000e+00> : vector<8xf32>
    %293 = vector.multi_reduction <add>, %292, %cst_94 [1] : vector<8x10xf32> to vector<8xf32>
    %294 = vector.shape_cast %293 : vector<8xf32> to vector<8x1xf32>
    %cst_95 = arith.constant 1.000000e+01 : f32
    %295 = vector.broadcast %cst_95 : f32 to vector<8x1xf32>
    %296 = arith.divf %294, %295 : vector<8x1xf32>
    %297 = vector.broadcast %296 : vector<8x1xf32> to vector<8x10xf32>
    %298 = arith.subf %292, %297 : vector<8x10xf32>
    %299 = arith.mulf %298, %298 : vector<8x10xf32>
    %cst_96 = arith.constant dense<0.000000e+00> : vector<8xf32>
    %300 = vector.multi_reduction <add>, %299, %cst_96 [1] : vector<8x10xf32> to vector<8xf32>
    %301 = vector.shape_cast %300 : vector<8xf32> to vector<8x1xf32>
    %cst_97 = arith.constant 1.000000e+01 : f32
    %302 = vector.broadcast %cst_97 : f32 to vector<8x1xf32>
    %303 = arith.divf %301, %302 : vector<8x1xf32>
    %cst_98 = arith.constant 9.99999974E-6 : f32
    %304 = vector.broadcast %cst_98 : f32 to vector<8x1xf32>
    %305 = arith.addf %303, %304 : vector<8x1xf32>
    %306 = math.rsqrt %305 : vector<8x1xf32>
    %307 = vector.broadcast %306 : vector<8x1xf32> to vector<8x10xf32>
    %308 = arith.mulf %298, %307 : vector<8x10xf32>
    %c268 = arith.constant 268 : index
    %c0_99 = arith.constant 0 : index
    %309 = vector.load %arg3[%c268, %c0_99] : memref<288x64xf32, #tpu.memory_space<vmem>>, vector<1x10xf32>
    %310 = vector.broadcast %309 : vector<1x10xf32> to vector<8x10xf32>
    %311 = arith.mulf %308, %310 : vector<8x10xf32>
    %c269 = arith.constant 269 : index
    %c0_100 = arith.constant 0 : index
    %312 = vector.load %arg3[%c269, %c0_100] : memref<288x64xf32, #tpu.memory_space<vmem>>, vector<1x10xf32>
    %313 = vector.broadcast %312 : vector<1x10xf32> to vector<8x10xf32>
    %314 = arith.addf %311, %313 : vector<8x10xf32>
    %c136 = arith.constant 136 : index
    %c0_101 = arith.constant 0 : index
    %315 = vector.load %arg3[%c136, %c0_101] : memref<288x64xf32, #tpu.memory_space<vmem>>, vector<10x30xf32>
    %c270 = arith.constant 270 : index
    %c0_102 = arith.constant 0 : index
    %316 = vector.load %arg3[%c270, %c0_102] : memref<288x64xf32, #tpu.memory_space<vmem>>, vector<1x30xf32>
    %317 = vector.extract_strided_slice %315 {offsets = [0, 0], sizes = [10, 10], strides = [1, 1]} : vector<10x30xf32> to vector<10x10xf32>
    %cst_103 = arith.constant dense<0.000000e+00> : vector<8x10xf32>
    %318 = tpu.matmul %314, %317, %cst_103 {dimension_numbers = #tpu.dot_dimension_numbers<[1], [0], [0], [1], [0, 0, 1, 1], [], []>} : vector<8x10xf32>, vector<10x10xf32>, vector<8x10xf32> -> vector<8x10xf32>
    %319 = vector.extract_strided_slice %316 {offsets = [0, 0], sizes = [1, 10], strides = [1, 1]} : vector<1x30xf32> to vector<1x10xf32>
    %320 = vector.broadcast %319 : vector<1x10xf32> to vector<8x10xf32>
    %321 = arith.addf %318, %320 : vector<8x10xf32>
    %322 = vector.extract_strided_slice %315 {offsets = [0, 10], sizes = [10, 20], strides = [1, 1]} : vector<10x30xf32> to vector<10x20xf32>
    %cst_104 = arith.constant dense<0.000000e+00> : vector<8x20xf32>
    %323 = tpu.matmul %189, %322, %cst_104 {dimension_numbers = #tpu.dot_dimension_numbers<[1], [0], [0], [1], [0, 0, 1, 1], [], []>} : vector<8x10xf32>, vector<10x20xf32>, vector<8x20xf32> -> vector<8x20xf32>
    %324 = vector.extract_strided_slice %316 {offsets = [0, 10], sizes = [1, 20], strides = [1, 1]} : vector<1x30xf32> to vector<1x20xf32>
    %325 = vector.broadcast %324 : vector<1x20xf32> to vector<8x20xf32>
    %326 = arith.addf %323, %325 : vector<8x20xf32>
    %327 = vector.extract_strided_slice %326 {offsets = [0, 0], sizes = [8, 10], strides = [1, 1]} : vector<8x20xf32> to vector<8x10xf32>
    %328 = vector.extract_strided_slice %326 {offsets = [0, 10], sizes = [8, 10], strides = [1, 1]} : vector<8x20xf32> to vector<8x10xf32>
    %329 = tpu.transpose %327, [1, 0] : vector<8x10xf32> -> vector<10x8xf32>
    %c152 = arith.constant 152 : index
    %c0_105 = arith.constant 0 : index
    %330 = vector.load %arg3[%c152, %c0_105] : memref<288x64xf32, #tpu.memory_space<vmem>>, vector<10x10xf32>
    %331 = vector.extract_strided_slice %321 {offsets = [0, 0], sizes = [8, 2], strides = [1, 1]} : vector<8x10xf32> to vector<8x2xf32>
    %332 = vector.extract_strided_slice %329 {offsets = [0, 0], sizes = [2, 8], strides = [1, 1]} : vector<10x8xf32> to vector<2x8xf32>
    %cst_106 = arith.constant dense<0.000000e+00> : vector<8x8xf32>
    %333 = tpu.matmul %331, %332, %cst_106 {dimension_numbers = #tpu.dot_dimension_numbers<[1], [0], [0], [1], [0, 0, 1, 1], [], []>} : vector<8x2xf32>, vector<2x8xf32>, vector<8x8xf32> -> vector<8x8xf32>
    %cst_107 = arith.constant dense<0xFF800000> : vector<8xf32>
    %334 = vector.multi_reduction <maximumf>, %333, %cst_107 [1] : vector<8x8xf32> to vector<8xf32>
    %335 = vector.shape_cast %334 : vector<8xf32> to vector<8x1xf32>
    %336 = vector.broadcast %335 : vector<8x1xf32> to vector<8x8xf32>
    %337 = arith.subf %333, %336 : vector<8x8xf32>
    %338 = math.exp %337 : vector<8x8xf32>
    %cst_108 = arith.constant dense<0.000000e+00> : vector<8xf32>
    %339 = vector.multi_reduction <add>, %338, %cst_108 [1] : vector<8x8xf32> to vector<8xf32>
    %340 = vector.shape_cast %339 : vector<8xf32> to vector<8x1xf32>
    %341 = tpu.reciprocal %340 {approx = true} : vector<8x1xf32> -> vector<8x1xf32>
    %342 = vector.broadcast %341 : vector<8x1xf32> to vector<8x8xf32>
    %343 = arith.mulf %338, %342 : vector<8x8xf32>
    %344 = vector.extract_strided_slice %328 {offsets = [0, 0], sizes = [8, 2], strides = [1, 1]} : vector<8x10xf32> to vector<8x2xf32>
    %cst_109 = arith.constant dense<0.000000e+00> : vector<8x2xf32>
    %345 = tpu.matmul %343, %344, %cst_109 {dimension_numbers = #tpu.dot_dimension_numbers<[1], [0], [0], [1], [0, 0, 1, 1], [], []>} : vector<8x8xf32>, vector<8x2xf32>, vector<8x2xf32> -> vector<8x2xf32>
    %346 = vector.extract_strided_slice %330 {offsets = [0, 0], sizes = [2, 10], strides = [1, 1]} : vector<10x10xf32> to vector<2x10xf32>
    %cst_110 = arith.constant dense<0.000000e+00> : vector<8x10xf32>
    %347 = tpu.matmul %345, %346, %cst_110 {dimension_numbers = #tpu.dot_dimension_numbers<[1], [0], [0], [1], [0, 0, 1, 1], [], []>} : vector<8x2xf32>, vector<2x10xf32>, vector<8x10xf32> -> vector<8x10xf32>
    %348 = vector.extract_strided_slice %321 {offsets = [0, 2], sizes = [8, 2], strides = [1, 1]} : vector<8x10xf32> to vector<8x2xf32>
    %349 = vector.extract_strided_slice %329 {offsets = [2, 0], sizes = [2, 8], strides = [1, 1]} : vector<10x8xf32> to vector<2x8xf32>
    %cst_111 = arith.constant dense<0.000000e+00> : vector<8x8xf32>
    %350 = tpu.matmul %348, %349, %cst_111 {dimension_numbers = #tpu.dot_dimension_numbers<[1], [0], [0], [1], [0, 0, 1, 1], [], []>} : vector<8x2xf32>, vector<2x8xf32>, vector<8x8xf32> -> vector<8x8xf32>
    %cst_112 = arith.constant dense<0xFF800000> : vector<8xf32>
    %351 = vector.multi_reduction <maximumf>, %350, %cst_112 [1] : vector<8x8xf32> to vector<8xf32>
    %352 = vector.shape_cast %351 : vector<8xf32> to vector<8x1xf32>
    %353 = vector.broadcast %352 : vector<8x1xf32> to vector<8x8xf32>
    %354 = arith.subf %350, %353 : vector<8x8xf32>
    %355 = math.exp %354 : vector<8x8xf32>
    %cst_113 = arith.constant dense<0.000000e+00> : vector<8xf32>
    %356 = vector.multi_reduction <add>, %355, %cst_113 [1] : vector<8x8xf32> to vector<8xf32>
    %357 = vector.shape_cast %356 : vector<8xf32> to vector<8x1xf32>
    %358 = tpu.reciprocal %357 {approx = true} : vector<8x1xf32> -> vector<8x1xf32>
    %359 = vector.broadcast %358 : vector<8x1xf32> to vector<8x8xf32>
    %360 = arith.mulf %355, %359 : vector<8x8xf32>
    %361 = vector.extract_strided_slice %328 {offsets = [0, 2], sizes = [8, 2], strides = [1, 1]} : vector<8x10xf32> to vector<8x2xf32>
    %cst_114 = arith.constant dense<0.000000e+00> : vector<8x2xf32>
    %362 = tpu.matmul %360, %361, %cst_114 {dimension_numbers = #tpu.dot_dimension_numbers<[1], [0], [0], [1], [0, 0, 1, 1], [], []>} : vector<8x8xf32>, vector<8x2xf32>, vector<8x2xf32> -> vector<8x2xf32>
    %363 = vector.extract_strided_slice %330 {offsets = [2, 0], sizes = [2, 10], strides = [1, 1]} : vector<10x10xf32> to vector<2x10xf32>
    %cst_115 = arith.constant dense<0.000000e+00> : vector<8x10xf32>
    %364 = tpu.matmul %362, %363, %cst_115 {dimension_numbers = #tpu.dot_dimension_numbers<[1], [0], [0], [1], [0, 0, 1, 1], [], []>} : vector<8x2xf32>, vector<2x10xf32>, vector<8x10xf32> -> vector<8x10xf32>
    %365 = arith.addf %347, %364 : vector<8x10xf32>
    %366 = vector.extract_strided_slice %321 {offsets = [0, 4], sizes = [8, 2], strides = [1, 1]} : vector<8x10xf32> to vector<8x2xf32>
    %367 = vector.extract_strided_slice %329 {offsets = [4, 0], sizes = [2, 8], strides = [1, 1]} : vector<10x8xf32> to vector<2x8xf32>
    %cst_116 = arith.constant dense<0.000000e+00> : vector<8x8xf32>
    %368 = tpu.matmul %366, %367, %cst_116 {dimension_numbers = #tpu.dot_dimension_numbers<[1], [0], [0], [1], [0, 0, 1, 1], [], []>} : vector<8x2xf32>, vector<2x8xf32>, vector<8x8xf32> -> vector<8x8xf32>
    %cst_117 = arith.constant dense<0xFF800000> : vector<8xf32>
    %369 = vector.multi_reduction <maximumf>, %368, %cst_117 [1] : vector<8x8xf32> to vector<8xf32>
    %370 = vector.shape_cast %369 : vector<8xf32> to vector<8x1xf32>
    %371 = vector.broadcast %370 : vector<8x1xf32> to vector<8x8xf32>
    %372 = arith.subf %368, %371 : vector<8x8xf32>
    %373 = math.exp %372 : vector<8x8xf32>
    %cst_118 = arith.constant dense<0.000000e+00> : vector<8xf32>
    %374 = vector.multi_reduction <add>, %373, %cst_118 [1] : vector<8x8xf32> to vector<8xf32>
    %375 = vector.shape_cast %374 : vector<8xf32> to vector<8x1xf32>
    %376 = tpu.reciprocal %375 {approx = true} : vector<8x1xf32> -> vector<8x1xf32>
    %377 = vector.broadcast %376 : vector<8x1xf32> to vector<8x8xf32>
    %378 = arith.mulf %373, %377 : vector<8x8xf32>
    %379 = vector.extract_strided_slice %328 {offsets = [0, 4], sizes = [8, 2], strides = [1, 1]} : vector<8x10xf32> to vector<8x2xf32>
    %cst_119 = arith.constant dense<0.000000e+00> : vector<8x2xf32>
    %380 = tpu.matmul %378, %379, %cst_119 {dimension_numbers = #tpu.dot_dimension_numbers<[1], [0], [0], [1], [0, 0, 1, 1], [], []>} : vector<8x8xf32>, vector<8x2xf32>, vector<8x2xf32> -> vector<8x2xf32>
    %381 = vector.extract_strided_slice %330 {offsets = [4, 0], sizes = [2, 10], strides = [1, 1]} : vector<10x10xf32> to vector<2x10xf32>
    %cst_120 = arith.constant dense<0.000000e+00> : vector<8x10xf32>
    %382 = tpu.matmul %380, %381, %cst_120 {dimension_numbers = #tpu.dot_dimension_numbers<[1], [0], [0], [1], [0, 0, 1, 1], [], []>} : vector<8x2xf32>, vector<2x10xf32>, vector<8x10xf32> -> vector<8x10xf32>
    %383 = arith.addf %365, %382 : vector<8x10xf32>
    %384 = vector.extract_strided_slice %321 {offsets = [0, 6], sizes = [8, 2], strides = [1, 1]} : vector<8x10xf32> to vector<8x2xf32>
    %385 = vector.extract_strided_slice %329 {offsets = [6, 0], sizes = [2, 8], strides = [1, 1]} : vector<10x8xf32> to vector<2x8xf32>
    %cst_121 = arith.constant dense<0.000000e+00> : vector<8x8xf32>
    %386 = tpu.matmul %384, %385, %cst_121 {dimension_numbers = #tpu.dot_dimension_numbers<[1], [0], [0], [1], [0, 0, 1, 1], [], []>} : vector<8x2xf32>, vector<2x8xf32>, vector<8x8xf32> -> vector<8x8xf32>
    %cst_122 = arith.constant dense<0xFF800000> : vector<8xf32>
    %387 = vector.multi_reduction <maximumf>, %386, %cst_122 [1] : vector<8x8xf32> to vector<8xf32>
    %388 = vector.shape_cast %387 : vector<8xf32> to vector<8x1xf32>
    %389 = vector.broadcast %388 : vector<8x1xf32> to vector<8x8xf32>
    %390 = arith.subf %386, %389 : vector<8x8xf32>
    %391 = math.exp %390 : vector<8x8xf32>
    %cst_123 = arith.constant dense<0.000000e+00> : vector<8xf32>
    %392 = vector.multi_reduction <add>, %391, %cst_123 [1] : vector<8x8xf32> to vector<8xf32>
    %393 = vector.shape_cast %392 : vector<8xf32> to vector<8x1xf32>
    %394 = tpu.reciprocal %393 {approx = true} : vector<8x1xf32> -> vector<8x1xf32>
    %395 = vector.broadcast %394 : vector<8x1xf32> to vector<8x8xf32>
    %396 = arith.mulf %391, %395 : vector<8x8xf32>
    %397 = vector.extract_strided_slice %328 {offsets = [0, 6], sizes = [8, 2], strides = [1, 1]} : vector<8x10xf32> to vector<8x2xf32>
    %cst_124 = arith.constant dense<0.000000e+00> : vector<8x2xf32>
    %398 = tpu.matmul %396, %397, %cst_124 {dimension_numbers = #tpu.dot_dimension_numbers<[1], [0], [0], [1], [0, 0, 1, 1], [], []>} : vector<8x8xf32>, vector<8x2xf32>, vector<8x2xf32> -> vector<8x2xf32>
    %399 = vector.extract_strided_slice %330 {offsets = [6, 0], sizes = [2, 10], strides = [1, 1]} : vector<10x10xf32> to vector<2x10xf32>
    %cst_125 = arith.constant dense<0.000000e+00> : vector<8x10xf32>
    %400 = tpu.matmul %398, %399, %cst_125 {dimension_numbers = #tpu.dot_dimension_numbers<[1], [0], [0], [1], [0, 0, 1, 1], [], []>} : vector<8x2xf32>, vector<2x10xf32>, vector<8x10xf32> -> vector<8x10xf32>
    %401 = arith.addf %383, %400 : vector<8x10xf32>
    %402 = vector.extract_strided_slice %321 {offsets = [0, 8], sizes = [8, 2], strides = [1, 1]} : vector<8x10xf32> to vector<8x2xf32>
    %403 = vector.extract_strided_slice %329 {offsets = [8, 0], sizes = [2, 8], strides = [1, 1]} : vector<10x8xf32> to vector<2x8xf32>
    %cst_126 = arith.constant dense<0.000000e+00> : vector<8x8xf32>
    %404 = tpu.matmul %402, %403, %cst_126 {dimension_numbers = #tpu.dot_dimension_numbers<[1], [0], [0], [1], [0, 0, 1, 1], [], []>} : vector<8x2xf32>, vector<2x8xf32>, vector<8x8xf32> -> vector<8x8xf32>
    %cst_127 = arith.constant dense<0xFF800000> : vector<8xf32>
    %405 = vector.multi_reduction <maximumf>, %404, %cst_127 [1] : vector<8x8xf32> to vector<8xf32>
    %406 = vector.shape_cast %405 : vector<8xf32> to vector<8x1xf32>
    %407 = vector.broadcast %406 : vector<8x1xf32> to vector<8x8xf32>
    %408 = arith.subf %404, %407 : vector<8x8xf32>
    %409 = math.exp %408 : vector<8x8xf32>
    %cst_128 = arith.constant dense<0.000000e+00> : vector<8xf32>
    %410 = vector.multi_reduction <add>, %409, %cst_128 [1] : vector<8x8xf32> to vector<8xf32>
    %411 = vector.shape_cast %410 : vector<8xf32> to vector<8x1xf32>
    %412 = tpu.reciprocal %411 {approx = true} : vector<8x1xf32> -> vector<8x1xf32>
    %413 = vector.broadcast %412 : vector<8x1xf32> to vector<8x8xf32>
    %414 = arith.mulf %409, %413 : vector<8x8xf32>
    %415 = vector.extract_strided_slice %328 {offsets = [0, 8], sizes = [8, 2], strides = [1, 1]} : vector<8x10xf32> to vector<8x2xf32>
    %cst_129 = arith.constant dense<0.000000e+00> : vector<8x2xf32>
    %416 = tpu.matmul %414, %415, %cst_129 {dimension_numbers = #tpu.dot_dimension_numbers<[1], [0], [0], [1], [0, 0, 1, 1], [], []>} : vector<8x8xf32>, vector<8x2xf32>, vector<8x2xf32> -> vector<8x2xf32>
    %417 = vector.extract_strided_slice %330 {offsets = [8, 0], sizes = [2, 10], strides = [1, 1]} : vector<10x10xf32> to vector<2x10xf32>
    %cst_130 = arith.constant dense<0.000000e+00> : vector<8x10xf32>
    %418 = tpu.matmul %416, %417, %cst_130 {dimension_numbers = #tpu.dot_dimension_numbers<[1], [0], [0], [1], [0, 0, 1, 1], [], []>} : vector<8x2xf32>, vector<2x10xf32>, vector<8x10xf32> -> vector<8x10xf32>
    %419 = arith.addf %401, %418 : vector<8x10xf32>
    %c271 = arith.constant 271 : index
    %c0_131 = arith.constant 0 : index
    %420 = vector.load %arg3[%c271, %c0_131] : memref<288x64xf32, #tpu.memory_space<vmem>>, vector<1x10xf32>
    %421 = vector.broadcast %420 : vector<1x10xf32> to vector<8x10xf32>
    %422 = arith.addf %419, %421 : vector<8x10xf32>
    %423 = arith.addf %314, %422 : vector<8x10xf32>
    %cst_132 = arith.constant dense<0.000000e+00> : vector<8xf32>
    %424 = vector.multi_reduction <add>, %423, %cst_132 [1] : vector<8x10xf32> to vector<8xf32>
    %425 = vector.shape_cast %424 : vector<8xf32> to vector<8x1xf32>
    %cst_133 = arith.constant 1.000000e+01 : f32
    %426 = vector.broadcast %cst_133 : f32 to vector<8x1xf32>
    %427 = arith.divf %425, %426 : vector<8x1xf32>
    %428 = vector.broadcast %427 : vector<8x1xf32> to vector<8x10xf32>
    %429 = arith.subf %423, %428 : vector<8x10xf32>
    %430 = arith.mulf %429, %429 : vector<8x10xf32>
    %cst_134 = arith.constant dense<0.000000e+00> : vector<8xf32>
    %431 = vector.multi_reduction <add>, %430, %cst_134 [1] : vector<8x10xf32> to vector<8xf32>
    %432 = vector.shape_cast %431 : vector<8xf32> to vector<8x1xf32>
    %cst_135 = arith.constant 1.000000e+01 : f32
    %433 = vector.broadcast %cst_135 : f32 to vector<8x1xf32>
    %434 = arith.divf %432, %433 : vector<8x1xf32>
    %cst_136 = arith.constant 9.99999974E-6 : f32
    %435 = vector.broadcast %cst_136 : f32 to vector<8x1xf32>
    %436 = arith.addf %434, %435 : vector<8x1xf32>
    %437 = math.rsqrt %436 : vector<8x1xf32>
    %438 = vector.broadcast %437 : vector<8x1xf32> to vector<8x10xf32>
    %439 = arith.mulf %429, %438 : vector<8x10xf32>
    %c272 = arith.constant 272 : index
    %c0_137 = arith.constant 0 : index
    %440 = vector.load %arg3[%c272, %c0_137] : memref<288x64xf32, #tpu.memory_space<vmem>>, vector<1x10xf32>
    %441 = vector.broadcast %440 : vector<1x10xf32> to vector<8x10xf32>
    %442 = arith.mulf %439, %441 : vector<8x10xf32>
    %c273 = arith.constant 273 : index
    %c0_138 = arith.constant 0 : index
    %443 = vector.load %arg3[%c273, %c0_138] : memref<288x64xf32, #tpu.memory_space<vmem>>, vector<1x10xf32>
    %444 = vector.broadcast %443 : vector<1x10xf32> to vector<8x10xf32>
    %445 = arith.addf %442, %444 : vector<8x10xf32>
    %c168 = arith.constant 168 : index
    %c0_139 = arith.constant 0 : index
    %446 = vector.load %arg3[%c168, %c0_139] : memref<288x64xf32, #tpu.memory_space<vmem>>, vector<10x50xf32>
    %c274 = arith.constant 274 : index
    %c0_140 = arith.constant 0 : index
    %447 = vector.load %arg3[%c274, %c0_140] : memref<288x64xf32, #tpu.memory_space<vmem>>, vector<1x50xf32>
    %cst_141 = arith.constant dense<0.000000e+00> : vector<8x50xf32>
    %448 = tpu.matmul %445, %446, %cst_141 {dimension_numbers = #tpu.dot_dimension_numbers<[1], [0], [0], [1], [0, 0, 1, 1], [], []>} : vector<8x10xf32>, vector<10x50xf32>, vector<8x50xf32> -> vector<8x50xf32>
    %449 = vector.broadcast %447 : vector<1x50xf32> to vector<8x50xf32>
    %450 = arith.addf %448, %449 : vector<8x50xf32>
    %cst_142 = arith.constant 0.000000e+00 : f32
    %451 = vector.broadcast %cst_142 : f32 to vector<8x50xf32>
    %452 = arith.maximumf %450, %451 : vector<8x50xf32>
    %c184 = arith.constant 184 : index
    %c0_143 = arith.constant 0 : index
    %453 = vector.load %arg3[%c184, %c0_143] : memref<288x64xf32, #tpu.memory_space<vmem>>, vector<50x10xf32>
    %c275 = arith.constant 275 : index
    %c0_144 = arith.constant 0 : index
    %454 = vector.load %arg3[%c275, %c0_144] : memref<288x64xf32, #tpu.memory_space<vmem>>, vector<1x10xf32>
    %cst_145 = arith.constant dense<0.000000e+00> : vector<8x10xf32>
    %455 = tpu.matmul %452, %453, %cst_145 {dimension_numbers = #tpu.dot_dimension_numbers<[1], [0], [0], [1], [0, 0, 1, 1], [], []>} : vector<8x50xf32>, vector<50x10xf32>, vector<8x10xf32> -> vector<8x10xf32>
    %456 = vector.broadcast %454 : vector<1x10xf32> to vector<8x10xf32>
    %457 = arith.addf %455, %456 : vector<8x10xf32>
    %458 = arith.addf %445, %457 : vector<8x10xf32>
    %cst_146 = arith.constant dense<0.000000e+00> : vector<8xf32>
    %459 = vector.multi_reduction <add>, %458, %cst_146 [1] : vector<8x10xf32> to vector<8xf32>
    %460 = vector.shape_cast %459 : vector<8xf32> to vector<8x1xf32>
    %cst_147 = arith.constant 1.000000e+01 : f32
    %461 = vector.broadcast %cst_147 : f32 to vector<8x1xf32>
    %462 = arith.divf %460, %461 : vector<8x1xf32>
    %463 = vector.broadcast %462 : vector<8x1xf32> to vector<8x10xf32>
    %464 = arith.subf %458, %463 : vector<8x10xf32>
    %465 = arith.mulf %464, %464 : vector<8x10xf32>
    %cst_148 = arith.constant dense<0.000000e+00> : vector<8xf32>
    %466 = vector.multi_reduction <add>, %465, %cst_148 [1] : vector<8x10xf32> to vector<8xf32>
    %467 = vector.shape_cast %466 : vector<8xf32> to vector<8x1xf32>
    %cst_149 = arith.constant 1.000000e+01 : f32
    %468 = vector.broadcast %cst_149 : f32 to vector<8x1xf32>
    %469 = arith.divf %467, %468 : vector<8x1xf32>
    %cst_150 = arith.constant 9.99999974E-6 : f32
    %470 = vector.broadcast %cst_150 : f32 to vector<8x1xf32>
    %471 = arith.addf %469, %470 : vector<8x1xf32>
    %472 = math.rsqrt %471 : vector<8x1xf32>
    %473 = vector.broadcast %472 : vector<8x1xf32> to vector<8x10xf32>
    %474 = arith.mulf %464, %473 : vector<8x10xf32>
    %c276 = arith.constant 276 : index
    %c0_151 = arith.constant 0 : index
    %475 = vector.load %arg3[%c276, %c0_151] : memref<288x64xf32, #tpu.memory_space<vmem>>, vector<1x10xf32>
    %476 = vector.broadcast %475 : vector<1x10xf32> to vector<8x10xf32>
    %477 = arith.mulf %474, %476 : vector<8x10xf32>
    %c277 = arith.constant 277 : index
    %c0_152 = arith.constant 0 : index
    %478 = vector.load %arg3[%c277, %c0_152] : memref<288x64xf32, #tpu.memory_space<vmem>>, vector<1x10xf32>
    %479 = vector.broadcast %478 : vector<1x10xf32> to vector<8x10xf32>
    %480 = arith.addf %477, %479 : vector<8x10xf32>
    %cst_153 = arith.constant dense<0.000000e+00> : vector<8xf32>
    %481 = vector.multi_reduction <add>, %480, %cst_153 [1] : vector<8x10xf32> to vector<8xf32>
    %482 = vector.shape_cast %481 : vector<8xf32> to vector<8x1xf32>
    %cst_154 = arith.constant 1.000000e+01 : f32
    %483 = vector.broadcast %cst_154 : f32 to vector<8x1xf32>
    %484 = arith.divf %482, %483 : vector<8x1xf32>
    %485 = vector.broadcast %484 : vector<8x1xf32> to vector<8x10xf32>
    %486 = arith.subf %480, %485 : vector<8x10xf32>
    %487 = arith.mulf %486, %486 : vector<8x10xf32>
    %cst_155 = arith.constant dense<0.000000e+00> : vector<8xf32>
    %488 = vector.multi_reduction <add>, %487, %cst_155 [1] : vector<8x10xf32> to vector<8xf32>
    %489 = vector.shape_cast %488 : vector<8xf32> to vector<8x1xf32>
    %cst_156 = arith.constant 1.000000e+01 : f32
    %490 = vector.broadcast %cst_156 : f32 to vector<8x1xf32>
    %491 = arith.divf %489, %490 : vector<8x1xf32>
    %cst_157 = arith.constant 9.99999974E-6 : f32
    %492 = vector.broadcast %cst_157 : f32 to vector<8x1xf32>
    %493 = arith.addf %491, %492 : vector<8x1xf32>
    %494 = math.rsqrt %493 : vector<8x1xf32>
    %495 = vector.broadcast %494 : vector<8x1xf32> to vector<8x10xf32>
    %496 = arith.mulf %486, %495 : vector<8x10xf32>
    %c278 = arith.constant 278 : index
    %c0_158 = arith.constant 0 : index
    %497 = vector.load %arg3[%c278, %c0_158] : memref<288x64xf32, #tpu.memory_space<vmem>>, vector<1x10xf32>
    %498 = vector.broadcast %497 : vector<1x10xf32> to vector<8x10xf32>
    %499 = arith.mulf %496, %498 : vector<8x10xf32>
    %c279 = arith.constant 279 : index
    %c0_159 = arith.constant 0 : index
    %500 = vector.load %arg3[%c279, %c0_159] : memref<288x64xf32, #tpu.memory_space<vmem>>, vector<1x10xf32>
    %501 = vector.broadcast %500 : vector<1x10xf32> to vector<8x10xf32>
    %502 = arith.addf %499, %501 : vector<8x10xf32>
    %c240 = arith.constant 240 : index
    %c0_160 = arith.constant 0 : index
    %503 = vector.load %arg3[%c240, %c0_160] : memref<288x64xf32, #tpu.memory_space<vmem>>, vector<10x10xf32>
    %c280 = arith.constant 280 : index
    %c0_161 = arith.constant 0 : index
    %504 = vector.load %arg3[%c280, %c0_161] : memref<288x64xf32, #tpu.memory_space<vmem>>, vector<1x10xf32>
    %cst_162 = arith.constant dense<0.000000e+00> : vector<8x10xf32>
    %505 = tpu.matmul %502, %503, %cst_162 {dimension_numbers = #tpu.dot_dimension_numbers<[1], [0], [0], [1], [0, 0, 1, 1], [], []>} : vector<8x10xf32>, vector<10x10xf32>, vector<8x10xf32> -> vector<8x10xf32>
    %506 = vector.broadcast %504 : vector<1x10xf32> to vector<8x10xf32>
    %507 = arith.addf %505, %506 : vector<8x10xf32>
    %c0_163 = arith.constant 0 : index
    %c0_164 = arith.constant 0 : index
    %c0_165 = arith.constant 0 : index
    %508 = vector.load %arg4[%c0_163, %c0_164, %c0_165] : memref<1x8x10xf32, #tpu.memory_space<vmem>>, vector<1x8x10xf32>
    %509 = vector.shape_cast %508 : vector<1x8x10xf32> to vector<8x10xf32>
    %510 = vector.shape_cast %507 : vector<8x10xf32> to vector<1x8x10xf32>
    tpu.vector_store %arg4[%c0_163, %c0_164, %c0_165], %510 {strides = array<i32>} : memref<1x8x10xf32, #tpu.memory_space<vmem>>, vector<1x8x10xf32>,
    return
  }
  func.func @transform_0(%arg0: i32) -> (i32, i32, i32) {
    %c0_i32 = arith.constant 0 : i32
    %c0_i32_0 = arith.constant 0 : i32
    %c0_i32_1 = arith.constant 0 : i32
    return %arg0, %c0_i32, %c0_i32_0 : i32, i32, i32
  }
  func.func @transform_1(%arg0: i32) -> (i32, i32, i32) {
    %c0_i32 = arith.constant 0 : i32
    %c0_i32_0 = arith.constant 0 : i32
    %c0_i32_1 = arith.constant 0 : i32
    return %arg0, %c0_i32, %c0_i32_0 : i32, i32, i32
  }
  func.func @transform_2(%arg0: i32) -> (i32, i32) {
    %c0_i32 = arith.constant 0 : i32
    %c0_i32_0 = arith.constant 0 : i32
    %c0_i32_1 = arith.constant 0 : i32
    return %c0_i32, %c0_i32_0 : i32, i32
  }
  func.func @transform_3(%arg0: i32) -> (i32, i32, i32) {
    %c0_i32 = arith.constant 0 : i32
    %c0_i32_0 = arith.constant 0 : i32
    %c0_i32_1 = arith.constant 0 : i32
    return %arg0, %c0_i32, %c0_i32_0 : i32, i32, i32
  }
}

</mosaic_0001>

<bundles_post_ra>
// kernel: tpu_custom_call.1
= control target key start
LH: loop header
LB: loop body
LE: loop exit
PB: predicated region body
PF: predicated region fallthrough
CT: control target
= control target key end

     0   :  { %8 = vsyncpa [#allocation3], 0  ;;  %s6427_s0 = inlined_call_operand.vmem [shape: f32[2,8,10], index: 0, kind: input, shape index: {}]   ;;  %s6428_s1 = inlined_call_operand.vmem [shape: f32[2,1,10], index: 1, kind: input, shape index: {}]   ;;  %s6429_s2 = inlined_call_operand.vmem [shape: f32[288,64], index: 2, kind: input, shape index: {}]   ;;  %s6430_s3 = inlined_call_operand.hbm [shape: f32[2,8,10], index: 3, kind: output, shape index: {}]  }
   0x1   :  { %10 = vsyncpa [#allocation3 + $0x1], 0  ;;  %s5710_s12 = smov 0   ;;  %s5712_s13 = smov 0  }
   0x2   :  { %s5714_s14 = smov 0   ;;  %s5716_s15 = smov 0  }
   0x3 LB: > { %s5731_s16 = sadd.s32 4294967295, %s5669_s15   ;;  %s4861_s17 = sadd.s32 4294967294, %s5669_s15   ;;  %s5669_s15 = sphi %s5716_s15, %s6448_s15   ;;  %s5665_s14 = sphi %s5714_s14, %s6447_s14   ;;  %s5661_s13 = sphi %s5712_s13, %s6446_s13   ;;  %s5657_s12 = sphi %s5710_s12, %s6445_s12  }
   0x4   : > { %s5735_s18 = sadd.s32 1, %s5669_s15   ;;  %s96_s19 = sadd.s32 1, %s5665_s14 }
   0x5   : > { %s93_s20 = ssub.s32 %s5669_s15, %s5735_s18  ;;  %p106_p0 = scmp.ne.s32.totalorder %s5665_s14, %s5661_s13 }
   0x6   : > { %p94_p1 = scmp.eq.s32.totalorder %s93_s20, 0  ;;  %p107_p2 = scmp.eq.s32.totalorder %s5731_s16, 1 }
   0x7   : > { %p112_p3 = scmp.ne.s32.totalorder %s5661_s13, %s5657_s12  ;;  %p113_p4 = scmp.eq.s32.totalorder %s4861_s17, 1 }
   0x8   : > { %s5746_s21 = scalar_select %p94_p1, %s5665_s14, %s96_s19  }
   0x9   : > { %p5748_p5 = por %p107_p2, %p106_p0  ;;  %p5752_p6 = por %p113_p4, %p112_p3 }
   0xa   : > { %p4864_p7 = scmp.ge.s32.totalorder %s5669_s15, 1  ;;  %p147_p8 = scmp.lt.s32.totalorder %s5669_s15, 3 }
   0xc   : > { %p148_p9 = pnand %p4864_p7, %p147_p8 }
   0xd   : > { %v190_v0 = vld [vmem:[%s6429_s2] sm:$0xff] (!%p148_p9)  ;;  %v191_v1 = vld [vmem:[%s6429_s2 + $0x8] sm:$0x3] (!%p148_p9)  ;;  %vm201_vm0 = vcmask (!%p148_p9), 1041408   ;;  %v5671_v2 = vmov (!%p148_p9), 0.0|0.0   ;;  %vm5672_vm1 = vmmov (!%p148_p9), 1  }
   0xe   : > { %151 = sbr.rel (%p148_p9) target bundleno = 11534 (0x2d0e), region = 32  ;;  %5425 = vmatprep.subr.bf16.mxu1 (!%p148_p9), %v5671_v2  ;;  %v5426_v3 = vpack.c.bf16 (!%p148_p9), %v191_v1, %v190_v0  ;;  %vm5766_vm2 = vmpackc.low (!%p148_p9), %vm201_vm0, %vm5672_vm1  ;;  %p173_p10 = scmp.lt.s32.totalorder (!%p148_p9), %s5731_s16, 1  ;;  %vm5673_vm3 = vmmov (!%p148_p9), 0   ;;  %v5674_v5 = vmov (!%p148_p9), 0.0   ;;  %vm197_vm4 = vcmask (!%p148_p9), 80896   ;;  %v5829_v33 = vld [vmem:[%s6429_s2 + $0x10] sm:$0xff] (!%p148_p9) }
   0xf   : > { %5121 = vmatprep.mubr.msk.f32.mxu1 (!%p148_p9), %vm5673_vm3, %v5674_v5  ;;  %5129 = vmatprep.subr.mxu0 (!%p148_p9), %v5674_v5  ;;  %v4868_v10 = vld [vmem:[%s6429_s2 + $0x100] ss:$0 sm:$0xff] (!%p148_p9)  ;;  %s5675_s11 = smov (!%p148_p9), 126   ;;  %s5676_s17 = smov (!%p148_p9), 118   ;;  %vm280_vm5 = vcmask (!%p148_p9), 15360   ;;  %vm355_vm6 = vcmask (!%p148_p9), 64512  }
  0x10   : > { %5428 = vmatpush3.bf16.msk.msra.mxu1 (!%p148_p9), %vm5766_vm2, %v5426_v3  ;;  %5131 = vmatprep.mubr.msk.f32.mxu0 (!%p148_p9), %vm5673_vm3, %v5674_v5  ;;  %s5677_s19 = smov (!%p148_p9), 116   ;;  %s5678_s20 = smov (!%p148_p9), 106   ;;  %v609_v34 = vrot.slane (!%p148_p9), %v5829_v33, 2  ;;  %vm1615_vm7 = vcmask (!%p148_p9), 408576   ;;  %v4983_v4 = vld [vmem:[%s6429_s2 + $0x118] ss:$0 sm:$0xff] (!%p148_p9) }
  0x11   : > { %5124 = vmatprep.subr.mxu1 (!%p148_p9), %v5674_v5  ;;  %s5679_s24 = smov (!%p148_p9), 108   ;;  %s5680_s25 = smov (!%p148_p9), 114  }
  0x12   : > { %s5681_s26 = smov (!%p148_p9), 124   ;;  %s5683_s30 = smov (!%p148_p9), 122  }
  0x13   : > { %s5684_s4 = smov (!%p148_p9), 104   ;;  %s6434_s6 = smov (!%p148_p9), 120  }
  0x14   : > { %s6432_s7 = smov (!%p148_p9), 110   ;;  %s6444_s27 = smov (!%p148_p9), 100  }
  0x15   : > { %s174_s28 = scalar_select %p173_p10, %s5731_s16, 1 }
  0x16   : > { %s4987_s10 = sshll.u32 %s5731_s16, 7  ;;  %s5689_s16 = smov [#allocation2]  }
  0x17   : > { %s4866_s29 = sshll.u32 %s174_s28, 3  ;;  %s179_s5 = scalar_lea.vmem %s6428_s1, %s174_s28 }
  0x18   : > { %s176_s8 = scalar_lea.vmem %s6427_s0, %s4866_s29  ;;  %v4867_v7 = vld [vmem:[%s179_s5] ss:$0 sm:$0xff]  ;;  %s5682_s29 = smov 112  }
  0x19   : > { %v180_v6 = vld [vmem:[%s176_s8] sm:$0xff]  ;;  %s6436_s5 = smov 102   ;;  %s6431_s8 = smov 100  }
  0x1a   : > { %v181_v8 = vmul.f32 7.071068, %v180_v6 }
  0x1c   : > { %v5786_v9 = vadd.f32 %v4867_v7, %v181_v8  ;;  %v925_v7 = vrot.slane %v5829_v33, 4 }
  0x1e   : > { %5122 = vmatmul.mubr.msk.f32.vlgmr.msra.gmra.mrb[0].mxu1 %vm197_vm4, %v5786_v9 }
  0x1f   : > { %5126 = vmatprep.mubr.msk.f32.mxu1 %vm5673_vm3, %v5674_v5 }
  0xf1   : > { %v271_v11 = vpop.f32.mrb[0].mxu1 }
  0xf2   : > { %v5795_v12 = vadd.f32 %v4868_v10, %v271_v11  ;;  %v5123_v13 = vpop.f32.mrb[1].mxu1 }
  0xf4   : > { %443 = vrot.lane.b32.xlu1 %v5795_v12, %s5675_s11  ;;  %278 = vrot.lane.b32.xlu0 %v5795_v12, %s5676_s17 }
  0xf8   : > { %445 = vrot.lane.b32.xlu0 %v5795_v12, %s5677_s19 }
 0x166   : > { %v279_v14 = vpop.permute.xlu0 %278  ;;  %v444_v16 = vpop.permute.xlu1 %443 }
 0x167   : > { %5125 = vmatpush3.xpose.msk.msra.mxu1 %vm280_vm5, %v279_v14 }
 0x168   : > { %5134 = vmatprep.subr.mxu1 %v5674_v5 }
 0x16a   : > { %5127 = vmatmul.mubr.msk.f32.vlgmr.msra.gmra.mrb[2].mxu1 %vm280_vm5, %v5795_v12  ;;  %v446_v15 = vpop.permute.xlu0 %445 }
 0x16b   : > { %5135 = vmatpush3.xpose.msk.msra.mxu1 %vm280_vm5, %v446_v15  ;;  %5136 = vmatprep.mubr.msk.f32.mxu1 %vm5673_vm3, %v5674_v5 }
 0x16c   : > { %5144 = vmatprep.subr.mxu1 %v5674_v5 }
 0x16e   : > { %5137 = vmatmul.mubr.msk.f32.vlgmr.msra.gmra.mrb[4].mxu1 %vm280_vm5, %v444_v16 }
 0x16f   : > { %5146 = vmatprep.mubr.msk.f32.mxu1 %vm5673_vm3, %v5674_v5  ;;  %5145 = vmatpush3.msk.msra.mxu1 %vm201_vm0, %v609_v34 }
 0x170   : > { %5154 = vmatprep.subr.mxu1 %v5674_v5 }
 0x23d   : > { %v351_v17 = vpop.f32.mrb[2].mxu1 }
 0x23e   : > { %v5128_v18 = vpop.f32.mrb[3].mxu1  ;;  %v356_v19 = vsel %vm355_vm6, %v351_v17, -inf }
 0x23f   : > { %357 = vmax.xlane.f32.xlu1 %v356_v19 }
 0x241   : > { %v517_v20 = vpop.f32.mrb[4].mxu1 }
 0x242   : > { %v5138_v21 = vpop.f32.mrb[5].mxu1  ;;  %v521_v22 = vsel %vm355_vm6, %v517_v20, -inf }
 0x243   : > { %522 = vmax.xlane.f32.xlu0 %v521_v22 }
 0x2cc   : > { %v358_v23 = vpop.xlane.xlu1 %357 }
 0x2cd   : > { %v359_v24 = vsub.f32 %v351_v17, %v358_v23 }
 0x2cf   : > { %v360_v25 = vmul.f32 1.442695, %v359_v24 }
 0x2d0   : > { %v523_v26 = vpop.xlane.xlu0 %522 }
 0x2d1   : > { %5533 = vpow2.f32 %v360_v25  ;;  %v524_v27 = vsub.f32 %v517_v20, %v523_v26 }
 0x2d3   : > { %v525_v28 = vmul.f32 1.442695, %v524_v27 }
 0x2d5   : > { %5535 = vpow2.f32 %v525_v28 }
 0x2db   : > { %v5534_v29 = vpop.eup %5533 }
 0x2dc   : > { %v362_v30 = vsel %vm355_vm6, %v5534_v29, 0.0 }
 0x2dd   : > { %363 = vadd.xlane.f32.xlu0 %v362_v30 }
 0x2df   : > { %v5536_v31 = vpop.eup %5535 }
 0x2e0   : > { %v527_v32 = vsel %vm355_vm6, %v5536_v31, 0.0 }
 0x2e1   : > { %528 = vadd.xlane.f32.xlu1 %v527_v32 }
 0x2f2   : > { %532 = vrot.lane.b32.xlu1 %v5795_v12, %s5678_s20 }
 0x2f3   : > { %367 = vrot.lane.b32.xlu0 %v5795_v12, %s5679_s24 }
 0x2f6   : > { %762 = vrot.lane.b32.xlu1 %v5795_v12, %s5680_s25 }
 0x2f7   : > { %760 = vrot.lane.b32.xlu0 %v5795_v12, %s5681_s26 }
 0x36a   : > { %v364_v35 = vpop.xlane.xlu0 %363 }
 0x36b   : > { %5537 = vrcp.f32 %v364_v35 }
 0x36e   : > { %v529_v36 = vpop.xlane.xlu1 %528  ;;  %v368_v37 = vpop.permute.xlu0 %367 }
 0x36f   : > { %5539 = vrcp.f32 %v529_v36  ;;  %5130 = vmatpush3.msra.mxu0 %v368_v37 }
 0x370   : > { %5139 = vmatprep.subr.mxu0 %v5674_v5 }
 0x372   : > { %v533_v40 = vpop.permute.xlu1 %532  ;;  %v761_v48 = vpop.permute.xlu0 %760 }
 0x375   : > { %v5538_v38 = vpop.eup %5537 }
 0x376   : > { %v366_v39 = vmul.f32 %v5538_v38, %v5534_v29  ;;  %v763_v46 = vpop.permute.xlu1 %762  ;;  %v1167_v29 = vrot.slane %v5829_v33, 6 }
 0x378   : > { %5132 = vmatmul.mubr.msk.f32.vlgmr.msra.gmra.mrb[0].mxu0 %vm355_vm6, %v366_v39 }
 0x379   : > { %v5540_v41 = vpop.eup %5539  ;;  %5140 = vmatpush3.msra.mxu0 %v533_v40  ;;  %5141 = vmatprep.mubr.msk.f32.mxu0 %vm5673_vm3, %v5674_v5  ;;  %v276_v40 = vld [vmem:[%s6429_s2 + $0x18] sm:$0x3] }
 0x37a   : > { %v531_v42 = vmul.f32 %v5540_v41, %v5536_v31  ;;  %5149 = vmatprep.subr.mxu0 %v5674_v5 }
 0x37c   : > { %5142 = vmatmul.mubr.msk.f32.vlgmr.msra.gmra.mrb[2].mxu0 %vm355_vm6, %v531_v42 }
 0x37d   : > { %5150 = vmatpush3.msk.msra.mxu0 %vm201_vm0, %v5829_v33  ;;  %5151 = vmatprep.mubr.msk.f32.mxu0 %vm5673_vm3, %v5674_v5 }
 0x37e   : > { %5159 = vmatprep.subr.mxu0 %v5674_v5 }
 0x44b   : > { %v439_v43 = vpop.f32.mrb[0].mxu0 }
 0x44c   : > { %v5133_v44 = vpop.f32.mrb[1].mxu0  ;;  %5152 = vmatmul.mubr.msk.f32.vlgmr.msra.gmra.mrb[4].mxu0 %vm280_vm5, %v439_v43 }
 0x44d   : > { %5161 = vmatprep.mubr.msk.f32.mxu0 %vm5673_vm3, %v5674_v5 }
 0x44f   : > { %v604_v45 = vpop.f32.mrb[2].mxu0 }
 0x450   : > { %v5143_v47 = vpop.f32.mrb[3].mxu0  ;;  %5147 = vmatmul.mubr.msk.f32.vlgmr.msra.gmra.mrb[6].mxu1 %vm280_vm5, %v604_v45 }
 0x451   : > { %5155 = vmatpush3.xpose.msk.msra.mxu1 %vm280_vm5, %v763_v46  ;;  %5156 = vmatprep.mubr.msk.f32.mxu1 %vm5673_vm3, %v5674_v5 }
 0x452   : > { %5164 = vmatprep.subr.mxu1 %v5674_v5 }
 0x454   : > { %5157 = vmatmul.mubr.msk.f32.vlgmr.msra.gmra.mrb[8].mxu1 %vm280_vm5, %v761_v48 }
 0x455   : > { %5166 = vmatprep.mubr.msk.f32.mxu1 %vm5673_vm3, %v5674_v5  ;;  %5165 = vmatpush3.msk.msra.mxu1 %vm201_vm0, %v925_v7  ;;  %v1606_v7 = vld [vmem:[%s6429_s2 + $0x48] sm:$0xff] }
 0x456   : > { %5174 = vmatprep.subr.mxu1 %v5674_v5 }
 0x51f   : > { %v756_v49 = vpop.f32.mrb[4].mxu0 }
 0x520   : > { %v5153_v50 = vpop.f32.mrb[5].mxu0 }
 0x521   : > { %v4896_v50 = vld [vmem:[%s6429_s2 + $0x101] ss:$0 sm:$0xff] }
 0x523   : > { %v681_v51 = vpop.f32.mrb[6].mxu1 }
 0x524   : > { %v757_v52 = vadd.f32 %v756_v49, %v681_v51  ;;  %v5148_v53 = vpop.f32.mrb[7].mxu1 }
 0x527   : > { %v834_v54 = vpop.f32.mrb[8].mxu1 }
 0x528   : > { %v5158_v55 = vpop.f32.mrb[9].mxu1  ;;  %v838_v56 = vsel %vm355_vm6, %v834_v54, -inf }
 0x529   : > { %839 = vmax.xlane.f32.xlu1 %v838_v56 }
 0x53a   : > { %1004 = vrot.lane.b32.xlu1 %v5795_v12, %s5682_s29 }
 0x53e   : > { %1002 = vrot.lane.b32.xlu1 %v5795_v12, %s5683_s30 }
 0x5b6   : > { %v840_v57 = vpop.xlane.xlu1 %839 }
 0x5b7   : > { %v841_v58 = vsub.f32 %v834_v54, %v840_v57 }
 0x5b9   : > { %v842_v59 = vmul.f32 1.442695, %v841_v58 }
 0x5ba   : > { %v1005_v1 = vpop.permute.xlu1 %1004 }
 0x5bb   : > { %5541 = vpow2.f32 %v842_v59 }
 0x5be   : > { %v1003_v6 = vpop.permute.xlu1 %1002 }
 0x5c5   : > { %v5542_v60 = vpop.eup %5541 }
 0x5c6   : > { %v844_v61 = vsel %vm355_vm6, %v5542_v60, 0.0 }
 0x5c7   : > { %845 = vadd.xlane.f32.xlu0 %v844_v61  ;;  %v1519_v61 = vld [vmem:[%s6429_s2 + $0x20] sm:$0xff] }
 0x5dd   : > { %849 = vrot.lane.b32.xlu0 %v5795_v12, %s5684_s4 }
 0x654   : > { %v846_v62 = vpop.xlane.xlu0 %845 }
 0x655   : > { %5543 = vrcp.f32 %v846_v62  ;;  %v1520_v62 = vld [vmem:[%s6429_s2 + $0x28] sm:$0x3] }
 0x658   : > { %v850_v63 = vpop.permute.xlu0 %849 }
 0x659   : > { %5160 = vmatpush3.msra.mxu0 %v850_v63  ;;  %v5430_v63 = vpack.c.bf16 %v1520_v62, %v1519_v61 }
 0x65a   : > { %5169 = vmatprep.subr.mxu0 %v5674_v5 }
 0x65f   : > { %v5544_v0 = vpop.eup %5543 }
 0x660   : > { %v848_v3 = vmul.f32 %v5544_v0, %v5542_v60  ;;  %v1603_v0 = vld [vmem:[%s6429_s2 + $0x30] sm:$0xff] }
 0x662   : > { %5162 = vmatmul.mubr.msk.f32.vlgmr.msra.gmra.mrb[6].mxu0 %vm355_vm6, %v848_v3  ;;  %v1605_v3 = vld [vmem:[%s6429_s2 + $0x40] sm:$0xff] }
 0x663   : > { %5170 = vmatpush3.xpose.msk.msra.mxu0 %vm280_vm5, %v1005_v1  ;;  %5171 = vmatprep.mubr.msk.f32.mxu0 %vm5673_vm3, %v5674_v5  ;;  %v1604_v1 = vld [vmem:[%s6429_s2 + $0x38] sm:$0xff] }
 0x664   : > { %5179 = vmatprep.subr.mxu0 %v5674_v5 }
 0x666   : > { %5172 = vmatmul.mubr.msk.f32.vlgmr.msra.gmra.mrb[8].mxu0 %vm280_vm5, %v1003_v6  ;;  %v5434_v6 = vpack.c.bf16 %v1604_v1, %v1603_v0 }
 0x667   : > { %5181 = vmatprep.mubr.msk.f32.mxu0 %vm5673_vm3, %v5674_v5  ;;  %5180 = vmatpush3.msk.msra.mxu0 %vm201_vm0, %v1167_v29 }
 0x668   : > { %5189 = vmatprep.subr.mxu0 %v5674_v5 }
 0x735   : > { %v921_v8 = vpop.f32.mrb[6].mxu0 }
 0x736   : > { %v5163_v10 = vpop.f32.mrb[7].mxu0  ;;  %5167 = vmatmul.mubr.msk.f32.vlgmr.msra.gmra.mrb[10].mxu1 %vm280_vm5, %v921_v8  ;;  %v5437_v8 = vpack.c.bf16 %v1606_v7, %v1605_v3 }
 0x737   : > { %5176 = vmatprep.mubr.msk.f32.mxu1 %vm5673_vm3, %v5674_v5 }
 0x739   : > { %v1076_v11 = vpop.f32.mrb[8].mxu0 }
 0x73a   : > { %v5173_v13 = vpop.f32.mrb[9].mxu0  ;;  %v1080_v14 = vsel %vm355_vm6, %v1076_v11, -inf }
 0x73b   : > { %1081 = vmax.xlane.f32.xlu0 %v1080_v14 }
 0x751   : > { %1091 = vrot.lane.b32.xlu0 %v5795_v12, %s6436_s5 }
 0x755   : > { %1244 = vrot.lane.b32.xlu0 %v5795_v12, %s6434_s6 }
 0x7c8   : > { %v1082_v15 = vpop.xlane.xlu0 %1081 }
 0x7c9   : > { %v1083_v16 = vsub.f32 %v1076_v11, %v1082_v15  ;;  %v4897_v15 = vld [vmem:[%s6429_s2 + $0x102] ss:$0 sm:$0xff] }
 0x7cb   : > { %v1084_v17 = vmul.f32 1.442695, %v1083_v16 }
 0x7cc   : > { %v1092_v18 = vpop.permute.xlu0 %1091 }
 0x7cd   : > { %5545 = vpow2.f32 %v1084_v17  ;;  %5175 = vmatpush3.msra.mxu1 %v1092_v18  ;;  %v1743_v17 = vld [vmem:[%s6429_s2 + $0x68] sm:$0xff]  ;;  %v1744_v18 = vld [vmem:[%s6429_s2 + $0x70] sm:$0x3] }
 0x7ce   : > { %5184 = vmatprep.subr.mxu1 %v5674_v5 }
 0x7d0   : > { %v1245_v28 = vpop.permute.xlu0 %1244 }
 0x7d7   : > { %v5546_v19 = vpop.eup %5545 }
 0x7d8   : > { %v1086_v20 = vsel %vm355_vm6, %v5546_v19, 0.0 }
 0x7d9   : > { %1087 = vadd.xlane.f32.xlu1 %v1086_v20 }
 0x7ea   : > { %1246 = vrot.lane.b32.xlu1 %v5795_v12, %s6432_s7  ;;  %s6384_s7 = scalar_lea.hbm %s6430_s3, %s4987_s10 }
 0x809   : > { %v997_v21 = vpop.f32.mrb[10].mxu1 }
 0x80a   : > { %v1001_v22 = vadd.f32 %v997_v21, %v757_v52  ;;  %v5168_v23 = vpop.f32.mrb[11].mxu1  ;;  %v5443_v21 = vpack.c.bf16 %v1744_v18, %v1743_v17 }
 0x80b   : > { %v1607_v23 = vld [vmem:[%s6429_s2 + $0x50] sm:$0xff] }
 0x866   : > { %v1088_v24 = vpop.xlane.xlu1 %1087 }
 0x867   : > { %5547 = vrcp.f32 %v1088_v24  ;;  %v1608_v24 = vld [vmem:[%s6429_s2 + $0x58] sm:$0xff] }
 0x86a   : > { %v1247_v27 = vpop.permute.xlu1 %1246 }
 0x871   : > { %v5548_v25 = vpop.eup %5547 }
 0x872   : > { %v1090_v26 = vmul.f32 %v5548_v25, %v5546_v19  ;;  %v4898_v19 = vld [vmem:[%s6429_s2 + $0x103] ss:$0 sm:$0xff]  ;;  %v5440_v25 = vpack.c.bf16 %v1608_v24, %v1607_v23 }
 0x874   : > { %5177 = vmatmul.mubr.msk.f32.vlgmr.msra.gmra.mrb[12].mxu1 %vm355_vm6, %v1090_v26  ;;  %v1609_v26 = vld [vmem:[%s6429_s2 + $0x60] sm:$0x3] }
 0x875   : > { %5185 = vmatpush3.xpose.msk.msra.mxu1 %vm280_vm5, %v1247_v27  ;;  %5186 = vmatprep.mubr.msk.f32.mxu1 %vm5673_vm3, %v5674_v5  ;;  %v4899_v27 = vld [vmem:[%s6429_s2 + $0x104] ss:$0 sm:$0xff] }
 0x876   : > { %5194 = vmatprep.subr.mxu1 %v5674_v5 }
 0x878   : > { %5187 = vmatmul.mubr.msk.f32.vlgmr.msra.gmra.mrb[14].mxu1 %vm280_vm5, %v1245_v28 }
 0x879   : > { %5196 = vmatprep.mubr.msk.f32.mxu1 %vm5673_vm3, %v5674_v5  ;;  %5195 = vmatpush3.msk.msra.mxu1 %vm201_vm0, %v276_v40 }
 0x87a   : > { %5433 = vmatprep.subr.bf16.mxu1 %v5671_v2 }
 0x947   : > { %v1163_v30 = vpop.f32.mrb[12].mxu1 }
 0x948   : > { %v5178_v31 = vpop.f32.mrb[13].mxu1  ;;  %5182 = vmatmul.mubr.msk.f32.vlgmr.msra.gmra.mrb[10].mxu0 %vm280_vm5, %v1163_v30 }
 0x949   : > { %5191 = vmatprep.mubr.msk.f32.mxu0 %vm5673_vm3, %v5674_v5  ;;  %v4909_v31 = vld [vmem:[%s6429_s2 + $0x10a] ss:$0 sm:$0xff] }
 0x94b   : > { %v1318_v32 = vpop.f32.mrb[14].mxu1 }
 0x94c   : > { %v5188_v34 = vpop.f32.mrb[15].mxu1  ;;  %v1322_v35 = vsel %vm355_vm6, %v1318_v32, -inf }
 0x94d   : > { %1323 = vmax.xlane.f32.xlu1 %v1322_v35 }
 0x9da   : > { %v1324_v36 = vpop.xlane.xlu1 %1323 }
 0x9db   : > { %v1325_v37 = vsub.f32 %v1318_v32, %v1324_v36 }
 0x9dd   : > { %v1326_v38 = vmul.f32 1.442695, %v1325_v37 }
 0x9df   : > { %5549 = vpow2.f32 %v1326_v38 }
 0x9e9   : > { %v5550_v33 = vpop.eup %5549 }
 0x9ea   : > { %v1328_v39 = vsel %vm355_vm6, %v5550_v33, 0.0 }
 0x9eb   : > { %1329 = vadd.xlane.f32.xlu0 %v1328_v39 }
 0xa01   : > { %1333 = vrot.lane.b32.xlu0 %v5795_v12, %s6431_s8 }
 0xa1b   : > { %v1239_v41 = vpop.f32.mrb[10].mxu0 }
 0xa1c   : > { %v1243_v42 = vadd.f32 %v1239_v41, %v1001_v22  ;;  %v5183_v43 = vpop.f32.mrb[11].mxu0 }
 0xa78   : > { %v1330_v44 = vpop.xlane.xlu0 %1329 }
 0xa79   : > { %5551 = vrcp.f32 %v1330_v44 }
 0xa7c   : > { %v1334_v45 = vpop.permute.xlu0 %1333 }
 0xa7d   : > { %5190 = vmatpush3.msra.mxu0 %v1334_v45 }
 0xa7e   : > { %5429 = vmatprep.subr.bf16.mxu0 %v5671_v2 }
 0xa83   : > { %v5552_v46 = vpop.eup %5551 }
 0xa84   : > { %v1332_v47 = vmul.f32 %v5552_v46, %v5550_v33 }
 0xa86   : > { %5192 = vmatmul.mubr.msk.f32.vlgmr.msra.gmra.mrb[12].mxu0 %vm355_vm6, %v1332_v47 }
 0xa87   : > { %5203 = vmatprep.mubr.msk.f32.mxu0 %vm5673_vm3, %v5674_v5  ;;  %5432 = vmatpush3.bf16.msk.msra.mxu0 %vm5766_vm2, %v5430_v63 }
 0xa88   : > { %5442 = vmatprep.subr.bf16.mxu0 %v5671_v2 }
 0xb59   : > { %v1405_v12 = vpop.f32.mrb[12].mxu0 }
 0xb5a   : > { %v5193_v48 = vpop.f32.mrb[13].mxu0  ;;  %5197 = vmatmul.mubr.msk.f32.vlgmr.msra.gmra.mrb[16].mxu1 %vm280_vm5, %v1405_v12 }
 0xb5b   : > { %5220 = vmatprep.mubr.msk.f32.mxu1 %vm5673_vm3, %v5674_v5  ;;  %5435 = vmatpush3.bf16.msra.mxu1 %v5434_v6 }
 0xb5c   : > { %5436 = vmatprep.subr.bf16.mxu1 %v5671_v2 }
 0xb5f   : > { %5438 = vmatpush3.bf16.msra.mxu1 %v5437_v8 }
 0xb60   : > { %5439 = vmatprep.subr.bf16.mxu1 %v5671_v2 }
 0xb63   : > { %5441 = vmatpush3.bf16.msra.mxu1 %v5440_v25 }
 0xb64   : > { %5218 = vmatprep.subr.mxu1 %v5674_v5 }
 0xb67   : > { %5219 = vmatpush3.msk.msra.mxu1 %vm201_vm0, %v1609_v26 }
 0xb68   : > { %5240 = vmatprep.subr.mxu1 %v5674_v5 }
 0xc2d   : > { %v1481_v49 = vpop.f32.mrb[16].mxu1 }
 0xc2e   : > { %v1485_v51 = vadd.f32 %v1481_v49, %v1243_v42  ;;  %v5198_v52 = vpop.f32.mrb[17].mxu1 }
 0xc30   : > { %v1491_v53 = vadd.f32 %v4896_v50, %v1485_v51 }
 0xc32   : > { %v1492_v54 = vadd.f32 %v1491_v53, %v5786_v9 }
 0xc34   : > { %v1493_v55 = vsel %vm197_vm4, %v1492_v54, 0.0 }
 0xc35   : > { %1494 = vadd.xlane.f32.xlu1 %v1493_v55 }
 0xcc2   : > { %v1495_v56 = vpop.xlane.xlu1 %1494 }
 0xcc3   : > { %v1497_v57 = vmul.f32 0.1, %v1495_v56  ;;  %v6029_v56 = vld [vmem:[%s6429_s2 + $0x78] sm:$0xff] }
 0xcc5   : > { %v1498_v58 = vsub.f32 %v1492_v54, %v1497_v57  ;;  %v2155_v57 = vrot.slane %v6029_v56, 2 }
 0xcc7   : > { %v1499_v59 = vmul.f32 %v1498_v58, %v1498_v58 }
 0xcc9   : > { %v1500_v60 = vsel %vm197_vm4, %v1499_v59, 0.0 }
 0xcca   : > { %1501 = vadd.xlane.f32.xlu1 %v1500_v60 }
 0xd57   : > { %v1502_v10 = vpop.xlane.xlu1 %1501 }
 0xd58   : > { %v1503_v11 = vmul.f32 0.1, %v1502_v10 }
 0xd5a   : > { %v1504_v13 = vadd.f32 1e-05, %v1503_v11 }
 0xd5c   : > { %5553 = vrsqrt.f32 %v1504_v13 }
 0xd66   : > { %v5554_v14 = vpop.eup %5553 }
 0xd67   : > { %v1506_v16 = vmul.f32 %v5554_v14, %v1498_v58 }
 0xd69   : > { %v1512_v20 = vmul.f32 %v4897_v15, %v1506_v16 }
 0xd6b   : > { %v5959_v22 = vadd.f32 %v4898_v19, %v1512_v20 }
 0xd6d   : > { %5204 = vmatmul.mubr.msk.f32.vlgmr.msra.gmra.mrb[14].mxu0 %vm197_vm4, %v5959_v22 }
 0xd6e   : > { %5445 = vmatpush3.bf16.msk.msra.mxu0 %vm5766_vm2, %v5443_v21  ;;  %5227 = vmatprep.mubr.msk.f32.mxu0 %vm5673_vm3, %v5674_v5 }
 0xd6f   : > { %5230 = vmatprep.subr.mxu0 %v5674_v5 }
 0xd71   : > { %5228 = vmatmul.mubr.msk.f32.vlgmr.msra.gmra.mrb[16].mxu0 %vm197_vm4, %v5786_v9 }
 0xd72   : > { %5232 = vmatprep.mubr.msk.f32.mxu0 %vm5673_vm3, %v5674_v5 }
 0xe40   : > { %v1598_v28 = vpop.f32.mrb[14].mxu0 }
 0xe41   : > { %v1599_v29 = vadd.f32 %v4899_v27, %v1598_v28  ;;  %v5205_v30 = vpop.f32.mrb[15].mxu0 }
 0xe43   : > { %v1602_v32 = vmax.f32 %v1599_v29, 0.0 }
 0xe44   : > { %v1819_v34 = vpop.f32.mrb[16].mxu0 }
 0xe45   : > { %v5990_v35 = vadd.f32 %v4909_v31, %v1819_v34  ;;  %5221 = vmatmul.mubr.msk.f32.vlgmr.msra.gmra.mrb[18].mxu1 %vm1615_vm7, %v1602_v32  ;;  %v5229_v36 = vpop.f32.mrb[17].mxu0  ;;  %v2471_v34 = vrot.slane %v6029_v56, 4 }
 0xe46   : > { %5242 = vmatprep.mubr.msk.f32.mxu1 %vm5673_vm3, %v5674_v5 }
 0xe47   : > { %1991 = vrot.lane.b32.xlu0 %v5990_v35, %s5677_s19  ;;  %1826 = vrot.lane.b32.xlu1 %v5990_v35, %s5676_s17 }
 0xe4b   : > { %1989 = vrot.lane.b32.xlu0 %v5990_v35, %s5675_s11 }
 0xeb9   : > { %v1992_v37 = vpop.permute.xlu0 %1991  ;;  %v1827_v38 = vpop.permute.xlu1 %1826 }
 0xeba   : > { %5231 = vmatpush3.xpose.msk.msra.mxu0 %vm280_vm5, %v1827_v38  ;;  %5241 = vmatpush3.xpose.msk.msra.mxu1 %vm280_vm5, %v1992_v37 }
 0xebb   : > { %5235 = vmatprep.subr.mxu0 %v5674_v5  ;;  %5250 = vmatprep.subr.mxu1 %v5674_v5 }
 0xebd   : > { %v1990_v33 = vpop.permute.xlu0 %1989  ;;  %5233 = vmatmul.mubr.msk.f32.vlgmr.msra.gmra.mrb[18].mxu0 %vm280_vm5, %v5990_v35 }
 0xebe   : > { %5243 = vmatmul.mubr.msk.f32.vlgmr.msra.gmra.mrb[20].mxu1 %vm280_vm5, %v1990_v33  ;;  %5237 = vmatprep.mubr.msk.f32.mxu0 %vm5673_vm3, %v5674_v5 }
 0xebf   : > { %5252 = vmatprep.mubr.msk.f32.mxu1 %vm5673_vm3, %v5674_v5  ;;  %5251 = vmatpush3.msk.msra.mxu1 %vm201_vm0, %v2155_v57 }
 0xec0   : > { %5260 = vmatprep.subr.mxu1 %v5674_v5 }
 0xf18   : > { %v6012_v39 = vpop.f32.mrb[18].mxu1 }
 0xf19   : > { %v5222_v40 = vpop.f32.mrb[19].mxu1 }
 0xf90   : > { %v1898_v41 = vpop.f32.mrb[18].mxu0 }
 0xf91   : > { %v5234_v42 = vpop.f32.mrb[19].mxu0  ;;  %v2063_v43 = vpop.f32.mrb[20].mxu1  ;;  %v1902_v44 = vsel %vm355_vm6, %v1898_v41, -inf }
 0xf92   : > { %1903 = vmax.xlane.f32.xlu1 %v1902_v44  ;;  %v5244_v45 = vpop.f32.mrb[21].mxu1  ;;  %v2067_v46 = vsel %vm355_vm6, %v2063_v43, -inf }
 0xf93   : > { %2068 = vmax.xlane.f32.xlu0 %v2067_v46 }
0x101f   : > { %v1904_v47 = vpop.xlane.xlu1 %1903 }
0x1020   : > { %v1905_v12 = vsub.f32 %v1898_v41, %v1904_v47  ;;  %v2069_v48 = vpop.xlane.xlu0 %2068 }
0x1021   : > { %v2070_v49 = vsub.f32 %v2063_v43, %v2069_v48 }
0x1022   : > { %v1906_v50 = vmul.f32 1.442695, %v1905_v12 }
0x1023   : > { %v2071_v51 = vmul.f32 1.442695, %v2070_v49 }
0x1024   : > { %5555 = vpow2.f32 %v1906_v50 }
0x1025   : > { %5557 = vpow2.f32 %v2071_v51 }
0x102e   : > { %v5556_v52 = vpop.eup %5555 }
0x102f   : > { %v5558_v53 = vpop.eup %5557  ;;  %v1908_v54 = vsel %vm355_vm6, %v5556_v52, 0.0 }
0x1030   : > { %1909 = vadd.xlane.f32.xlu0 %v1908_v54  ;;  %v2073_v55 = vsel %vm355_vm6, %v5558_v53, 0.0  ;;  %v2713_v54 = vrot.slane %v6029_v56, 6 }
0x1031   : > { %2074 = vadd.xlane.f32.xlu1 %v2073_v55  ;;  %v4902_v55 = vld [vmem:[%s6429_s2 + $0x105] ss:$0 sm:$0xff] }
0x1042   : > { %2078 = vrot.lane.b32.xlu1 %v5990_v35, %s5678_s20  ;;  %s6441_s20 = smov 102  }
0x1046   : > { %1913 = vrot.lane.b32.xlu0 %v5990_v35, %s5679_s24  ;;  %2308 = vrot.lane.b32.xlu1 %v5990_v35, %s5680_s25  ;;  %s6442_s24 = smov 120  }
0x104a   : > { %2306 = vrot.lane.b32.xlu0 %v5990_v35, %s5681_s26 }
0x10bd   : > { %v1910_v58 = vpop.xlane.xlu0 %1909 }
0x10be   : > { %5559 = vrcp.f32 %v1910_v58  ;;  %v2075_v59 = vpop.xlane.xlu1 %2074  ;;  %v1689_v58 = vadd.f32 %v4902_v55, %v6012_v39 }
0x10bf   : > { %5561 = vrcp.f32 %v2075_v59 }
0x10c1   : > { %v1914_v60 = vpop.permute.xlu0 %1913 }
0x10c2   : > { %5236 = vmatpush3.msra.mxu0 %v1914_v60  ;;  %v2079_v0 = vpop.permute.xlu1 %2078 }
0x10c3   : > { %5245 = vmatprep.subr.mxu0 %v5674_v5 }
0x10c5   : > { %v2307_v11 = vpop.permute.xlu0 %2306 }
0x10c6   : > { %v2309_v8 = vpop.permute.xlu1 %2308 }
0x10c8   : > { %v5560_v61 = vpop.eup %5559 }
0x10c9   : > { %v1912_v62 = vmul.f32 %v5560_v61, %v5556_v52  ;;  %v5562_v63 = vpop.eup %5561 }
0x10ca   : > { %v2077_v1 = vmul.f32 %v5562_v63, %v5558_v53 }
0x10cb   : > { %5238 = vmatmul.mubr.msk.f32.vlgmr.msra.gmra.mrb[20].mxu0 %vm355_vm6, %v1912_v62  ;;  %v1692_v62 = vadd.f32 %v1689_v58, %v5959_v22 }
0x10cc   : > { %5246 = vmatpush3.msra.mxu0 %v2079_v0  ;;  %5247 = vmatprep.mubr.msk.f32.mxu0 %vm5673_vm3, %v5674_v5 }
0x10cd   : > { %5255 = vmatprep.subr.mxu0 %v5674_v5  ;;  %v1693_v63 = vsel %vm197_vm4, %v1692_v62, 0.0 }
0x10cf   : > { %5248 = vmatmul.mubr.msk.f32.vlgmr.msra.gmra.mrb[22].mxu0 %vm355_vm6, %v2077_v1 }
0x10d0   : > { %5256 = vmatpush3.msk.msra.mxu0 %vm201_vm0, %v6029_v56  ;;  %5257 = vmatprep.mubr.msk.f32.mxu0 %vm5673_vm3, %v5674_v5 }
0x10d1   : > { %5265 = vmatprep.subr.mxu0 %v5674_v5 }
0x119e   : > { %v1985_v3 = vpop.f32.mrb[20].mxu0 }
0x119f   : > { %v5239_v6 = vpop.f32.mrb[21].mxu0  ;;  %5258 = vmatmul.mubr.msk.f32.vlgmr.msra.gmra.mrb[24].mxu0 %vm280_vm5, %v1985_v3 }
0x11a0   : > { %5267 = vmatprep.mubr.msk.f32.mxu0 %vm5673_vm3, %v5674_v5 }
0x11a2   : > { %v2150_v7 = vpop.f32.mrb[22].mxu0 }
0x11a3   : > { %v5249_v10 = vpop.f32.mrb[23].mxu0  ;;  %5253 = vmatmul.mubr.msk.f32.vlgmr.msra.gmra.mrb[22].mxu1 %vm280_vm5, %v2150_v7 }
0x11a4   : > { %5261 = vmatpush3.xpose.msk.msra.mxu1 %vm280_vm5, %v2309_v8  ;;  %5262 = vmatprep.mubr.msk.f32.mxu1 %vm5673_vm3, %v5674_v5 }
0x11a5   : > { %5270 = vmatprep.subr.mxu1 %v5674_v5 }
0x11a7   : > { %5263 = vmatmul.mubr.msk.f32.vlgmr.msra.gmra.mrb[24].mxu1 %vm280_vm5, %v2307_v11 }
0x11a8   : > { %5272 = vmatprep.mubr.msk.f32.mxu1 %vm5673_vm3, %v5674_v5  ;;  %5271 = vmatpush3.msk.msra.mxu1 %vm201_vm0, %v2471_v34  ;;  %v3064_v34 = vld [vmem:[%s6429_s2 + $0x88] sm:$0xff] }
0x11a9   : > { %5280 = vmatprep.subr.mxu1 %v5674_v5 }
0x1272   : > { %v2302_v13 = vpop.f32.mrb[24].mxu0 }
0x1273   : > { %v5259_v14 = vpop.f32.mrb[25].mxu0 }
0x1276   : > { %v2227_v15 = vpop.f32.mrb[22].mxu1 }
0x1277   : > { %v2303_v16 = vadd.f32 %v2302_v13, %v2227_v15  ;;  %v5254_v17 = vpop.f32.mrb[23].mxu1 }
0x127a   : > { %v2380_v18 = vpop.f32.mrb[24].mxu1 }
0x127b   : > { %v5264_v19 = vpop.f32.mrb[25].mxu1  ;;  %v2384_v20 = vsel %vm355_vm6, %v2380_v18, -inf }
0x127c   : > { %2385 = vmax.xlane.f32.xlu1 %v2384_v20 }
0x128d   : > { %2550 = vrot.lane.b32.xlu1 %v5990_v35, %s5682_s29 }
0x1291   : > { %2548 = vrot.lane.b32.xlu1 %v5990_v35, %s5683_s30 }
0x1309   : > { %v2386_v21 = vpop.xlane.xlu1 %2385 }
0x130a   : > { %v2387_v23 = vsub.f32 %v2380_v18, %v2386_v21 }
0x130c   : > { %v2388_v24 = vmul.f32 1.442695, %v2387_v23  ;;  %v4905_v23 = vld [vmem:[%s6429_s2 + $0x106] ss:$0 sm:$0xff] }
0x130d   : > { %v2551_v30 = vpop.permute.xlu1 %2550 }
0x130e   : > { %5563 = vpow2.f32 %v2388_v24 }
0x1311   : > { %v2549_v32 = vpop.permute.xlu1 %2548 }
0x1318   : > { %v5564_v25 = vpop.eup %5563 }
0x1319   : > { %v2390_v26 = vsel %vm355_vm6, %v5564_v25, 0.0 }
0x131a   : > { %2391 = vadd.xlane.f32.xlu0 %v2390_v26  ;;  %v4906_v26 = vld [vmem:[%s6429_s2 + $0x107] ss:$0 sm:$0xff] }
0x1330   : > { %2395 = vrot.lane.b32.xlu0 %v5990_v35, %s5684_s4  ;;  %s6443_s4 = smov 110  }
0x13a7   : > { %v2392_v27 = vpop.xlane.xlu0 %2391 }
0x13a8   : > { %5565 = vrcp.f32 %v2392_v27 }
0x13ab   : > { %v2396_v28 = vpop.permute.xlu0 %2395 }
0x13ac   : > { %5266 = vmatpush3.msra.mxu0 %v2396_v28 }
0x13ad   : > { %5275 = vmatprep.subr.mxu0 %v5674_v5 }
0x13b2   : > { %v5566_v29 = vpop.eup %5565 }
0x13b3   : > { %v2394_v31 = vmul.f32 %v5566_v29, %v5564_v25 }
0x13b5   : > { %5268 = vmatmul.mubr.msk.f32.vlgmr.msra.gmra.mrb[26].mxu0 %vm355_vm6, %v2394_v31 }
0x13b6   : > { %5276 = vmatpush3.xpose.msk.msra.mxu0 %vm280_vm5, %v2551_v30  ;;  %5277 = vmatprep.mubr.msk.f32.mxu0 %vm5673_vm3, %v5674_v5  ;;  %v1824_v30 = vld [vmem:[%s6429_s2 + $0x80] sm:$0x3] }
0x13b7   : > { %5285 = vmatprep.subr.mxu0 %v5674_v5 }
0x13b9   : > { %5278 = vmatmul.mubr.msk.f32.vlgmr.msra.gmra.mrb[28].mxu0 %vm280_vm5, %v2549_v32 }
0x13ba   : > { %5287 = vmatprep.mubr.msk.f32.mxu0 %vm5673_vm3, %v5674_v5  ;;  %5286 = vmatpush3.msk.msra.mxu0 %vm201_vm0, %v2713_v54 }
0x13bb   : > { %5295 = vmatprep.subr.mxu0 %v5674_v5 }
0x1488   : > { %v2467_v36 = vpop.f32.mrb[26].mxu0 }
0x1489   : > { %v5269_v37 = vpop.f32.mrb[27].mxu0  ;;  %5273 = vmatmul.mubr.msk.f32.vlgmr.msra.gmra.mrb[26].mxu1 %vm280_vm5, %v2467_v36  ;;  %v3065_v36 = vld [vmem:[%s6429_s2 + $0x90] sm:$0x3] }
0x148a   : > { %5282 = vmatprep.mubr.msk.f32.mxu1 %vm5673_vm3, %v5674_v5  ;;  %v5528_v37 = vpack.i.bf16 %v3065_v36, %v3064_v34 }
0x148c   : > { %v2622_v38 = vpop.f32.mrb[28].mxu0 }
0x148d   : > { %v5279_v33 = vpop.f32.mrb[29].mxu0  ;;  %v2626_v40 = vsel %vm355_vm6, %v2622_v38, -inf }
0x148e   : > { %2627 = vmax.xlane.f32.xlu0 %v2626_v40 }
0x14a4   : > { %2637 = vrot.lane.b32.xlu0 %v5990_v35, %s6441_s20 }
0x14a8   : > { %2790 = vrot.lane.b32.xlu0 %v5990_v35, %s6442_s24 }
0x151b   : > { %v2628_v41 = vpop.xlane.xlu0 %2627 }
0x151c   : > { %v2629_v42 = vsub.f32 %v2622_v38, %v2628_v41  ;;  %v5447_v38 = vpack.c.bf16 %v3065_v36, %v3064_v34 }
0x151e   : > { %v2630_v43 = vmul.f32 1.442695, %v2629_v42  ;;  %v4937_v42 = vld [vmem:[%s6429_s2 + $0x10b] ss:$0 sm:$0xff] }
0x151f   : > { %v2638_v44 = vpop.permute.xlu0 %2637 }
0x1520   : > { %5567 = vpow2.f32 %v2630_v43  ;;  %5281 = vmatpush3.msra.mxu1 %v2638_v44 }
0x1521   : > { %5290 = vmatprep.subr.mxu1 %v5674_v5 }
0x1523   : > { %v2791_v53 = vpop.permute.xlu0 %2790 }
0x152a   : > { %v5568_v45 = vpop.eup %5567 }
0x152b   : > { %v2632_v46 = vsel %vm355_vm6, %v5568_v45, 0.0 }
0x152c   : > { %2633 = vadd.xlane.f32.xlu1 %v2632_v46 }
0x153d   : > { %2792 = vrot.lane.b32.xlu1 %v5990_v35, %s6443_s4 }
0x155c   : > { %v2543_v47 = vpop.f32.mrb[26].mxu1 }
0x155d   : > { %v2547_v12 = vadd.f32 %v2543_v47, %v2303_v16  ;;  %v5274_v48 = vpop.f32.mrb[27].mxu1 }
0x15b9   : > { %v2634_v49 = vpop.xlane.xlu1 %2633 }
0x15ba   : > { %5569 = vrcp.f32 %v2634_v49 }
0x15bd   : > { %v2793_v52 = vpop.permute.xlu1 %2792 }
0x15c4   : > { %v5570_v50 = vpop.eup %5569 }
0x15c5   : > { %v2636_v51 = vmul.f32 %v5570_v50, %v5568_v45 }
0x15c7   : > { %5283 = vmatmul.mubr.msk.f32.vlgmr.msra.gmra.mrb[28].mxu1 %vm355_vm6, %v2636_v51 }
0x15c8   : > { %5291 = vmatpush3.xpose.msk.msra.mxu1 %vm280_vm5, %v2793_v52  ;;  %5292 = vmatprep.mubr.msk.f32.mxu1 %vm5673_vm3, %v5674_v5 }
0x15c9   : > { %5300 = vmatprep.subr.mxu1 %v5674_v5 }
0x15cb   : > { %5293 = vmatmul.mubr.msk.f32.vlgmr.msra.gmra.mrb[30].mxu1 %vm280_vm5, %v2791_v53 }
0x15cc   : > { %5302 = vmatprep.mubr.msk.f32.mxu1 %vm5673_vm3, %v5674_v5  ;;  %5301 = vmatpush3.msk.msra.mxu1 %vm201_vm0, %v1824_v30 }
0x15cd   : > { %5450 = vmatprep.subr.bf16.mxu1 %v5671_v2 }
0x169a   : > { %v2709_v57 = vpop.f32.mrb[28].mxu1 }
0x169b   : > { %v5284_v59 = vpop.f32.mrb[29].mxu1  ;;  %5288 = vmatmul.mubr.msk.f32.vlgmr.msra.gmra.mrb[30].mxu0 %vm280_vm5, %v2709_v57 }
0x169c   : > { %5297 = vmatprep.mubr.msk.f32.mxu0 %vm5673_vm3, %v5674_v5 }
0x169e   : > { %v2864_v60 = vpop.f32.mrb[30].mxu1 }
0x169f   : > { %v5294_v61 = vpop.f32.mrb[31].mxu1  ;;  %v2868_v56 = vsel %vm355_vm6, %v2864_v60, -inf }
0x16a0   : > { %2869 = vmax.xlane.f32.xlu1 %v2868_v56 }
0x16a4   : > { %1694 = vadd.xlane.f32.xlu1 %v1693_v63 }
0x172d   : > { %v2870_v0 = vpop.xlane.xlu1 %2869 }
0x172e   : > { %v2871_v1 = vsub.f32 %v2864_v60, %v2870_v0  ;;  %v4908_v0 = vld [vmem:[%s6429_s2 + $0x109] ss:$0 sm:$0xff] }
0x1730   : > { %v2872_v3 = vmul.f32 1.442695, %v2871_v1 }
0x1731   : > { %v1695_v39 = vpop.xlane.xlu1 %1694 }
0x1732   : > { %5571 = vpow2.f32 %v2872_v3  ;;  %v1696_v6 = vmul.f32 0.1, %v1695_v39  ;;  %v4940_v3 = vld [vmem:[%s6429_s2 + $0x10e] ss:$0 sm:$0xff] }
0x1734   : > { %v1697_v7 = vsub.f32 %v1692_v62, %v1696_v6  ;;  %v4907_v62 = vld [vmem:[%s6429_s2 + $0x108] ss:$0 sm:$0xff] }
0x1736   : > { %v1698_v8 = vmul.f32 %v1697_v7, %v1697_v7 }
0x1738   : > { %v1699_v10 = vsel %vm197_vm4, %v1698_v8, 0.0 }
0x1739   : > { %1700 = vadd.xlane.f32.xlu1 %v1699_v10 }
0x173c   : > { %v5572_v11 = vpop.eup %5571 }
0x173d   : > { %v2874_v13 = vsel %vm355_vm6, %v5572_v11, 0.0 }
0x173e   : > { %2875 = vadd.xlane.f32.xlu0 %v2874_v13 }
0x1754   : > { %2879 = vrot.lane.b32.xlu0 %v5990_v35, %s6444_s27 }
0x1758   : > { %5529 = vrot.lane.b32.xlu0 %v5528_v37, %s5676_s17 }
0x176e   : > { %v2785_v22 = vpop.f32.mrb[30].mxu0 }
0x176f   : > { %v2789_v14 = vadd.f32 %v2785_v22, %v2547_v12  ;;  %v5289_v15 = vpop.f32.mrb[31].mxu0  ;;  %v4939_v22 = vld [vmem:[%s6429_s2 + $0x10d] ss:$0 sm:$0xff] }
0x17c6   : > { %v1701_v16 = vpop.xlane.xlu1 %1700 }
0x17c7   : > { %v1702_v17 = vmul.f32 0.1, %v1701_v16 }
0x17c9   : > { %v1703_v18 = vadd.f32 1e-05, %v1702_v17 }
0x17cb   : > { %5573 = vrsqrt.f32 %v1703_v18  ;;  %v2876_v19 = vpop.xlane.xlu0 %2875 }
0x17cc   : > { %5575 = vrcp.f32 %v2876_v19 }
0x17cf   : > { %v2880_v20 = vpop.permute.xlu0 %2879 }
0x17d0   : > { %5296 = vmatpush3.msra.mxu0 %v2880_v20 }
0x17d1   : > { %5446 = vmatprep.subr.bf16.mxu0 %v5671_v2 }
0x17d3   : > { %v5530_v50 = vpop.permute.xlu0 %5529 }
0x17d4   : > { %v5532_v51 = vunpack.i.h.bf16 %v5530_v50  ;;  %v5531_v52 = vunpack.i.l.bf16 %v5530_v50  ;;  %v3232_v50 = vld [vmem:[%s6429_s2 + $0x98] sm:$0xff] }
0x17d5   : > { %v5574_v21 = vpop.eup %5573 }
0x17d6   : > { %v5576_v24 = vpop.eup %5575  ;;  %v1705_v35 = vmul.f32 %v5574_v21, %v1697_v7  ;;  %v5451_v53 = vpack.c.bf16 %v5532_v51, %v5531_v52  ;;  %v3563_v51 = vrot.slane %v3232_v50, 2 }
0x17d7   : > { %v2878_v25 = vmul.f32 %v5576_v24, %v5572_v11  ;;  %v4938_v11 = vld [vmem:[%s6429_s2 + $0x10c] ss:$0 sm:$0xff] }
0x17d8   : > { %v1711_v27 = vmul.f32 %v4905_v23, %v1705_v35 }
0x17d9   : > { %5298 = vmatmul.mubr.msk.f32.vlgmr.msra.gmra.mrb[32].mxu0 %vm355_vm6, %v2878_v25 }
0x17da   : > { %v1717_v28 = vadd.f32 %v4906_v26, %v1711_v27  ;;  %5309 = vmatprep.mubr.msk.f32.mxu0 %vm5673_vm3, %v5674_v5  ;;  %5449 = vmatpush3.bf16.msk.msra.mxu0 %vm5766_vm2, %v5447_v38 }
0x17db   : > { %5319 = vmatprep.subr.mxu0 %v5674_v5 }
0x17dc   : > { %v1718_v29 = vsel %vm197_vm4, %v1717_v28, 0.0 }
0x17dd   : > { %1719 = vadd.xlane.f32.xlu1 %v1718_v29 }
0x186a   : > { %v1720_v33 = vpop.xlane.xlu1 %1719 }
0x186b   : > { %v1721_v40 = vmul.f32 0.1, %v1720_v33 }
0x186d   : > { %v1722_v45 = vsub.f32 %v1717_v28, %v1721_v40 }
0x186f   : > { %v1723_v48 = vmul.f32 %v1722_v45, %v1722_v45 }
0x1871   : > { %v1724_v49 = vsel %vm197_vm4, %v1723_v48, 0.0 }
0x18ac   : > { %v2951_v31 = vpop.f32.mrb[32].mxu0 }
0x18ad   : > { %v5299_v32 = vpop.f32.mrb[33].mxu0  ;;  %5303 = vmatmul.mubr.msk.f32.vlgmr.msra.gmra.mrb[32].mxu1 %vm280_vm5, %v2951_v31 }
0x18ae   : > { %5316 = vmatprep.mubr.msk.f32.mxu1 %vm5673_vm3, %v5674_v5  ;;  %5453 = vmatpush3.bf16.msk.msra.mxu1 %vm5766_vm2, %v5451_v53 }
0x18af   : > { %5324 = vmatprep.subr.mxu1 %v5674_v5 }
0x1980   : > { %v3027_v41 = vpop.f32.mrb[32].mxu1 }
0x1981   : > { %v3031_v43 = vadd.f32 %v3027_v41, %v2789_v14  ;;  %v5304_v44 = vpop.f32.mrb[33].mxu1 }
0x1983   : > { %v3037_v46 = vadd.f32 %v4937_v42, %v3031_v43 }
0x1985   : > { %v3038_v47 = vadd.f32 %v3037_v46, %v5786_v9 }
0x1987   : > { %v3039_v12 = vsel %vm197_vm4, %v3038_v47, 0.0 }
0x1988   : > { %3040 = vadd.xlane.f32.xlu1 %v3039_v12 }
0x198c   : > { %1725 = vadd.xlane.f32.xlu1 %v1724_v49 }
0x1a15   : > { %v3041_v54 = vpop.xlane.xlu1 %3040 }
0x1a16   : > { %v3042_v55 = vmul.f32 0.1, %v3041_v54 }
0x1a18   : > { %v3043_v57 = vsub.f32 %v3038_v47, %v3042_v55 }
0x1a19   : > { %v1726_v9 = vpop.xlane.xlu1 %1725 }
0x1a1a   : > { %v1727_v58 = vmul.f32 0.1, %v1726_v9  ;;  %v3044_v59 = vmul.f32 %v3043_v57, %v3043_v57  ;;  %v3879_v9 = vrot.slane %v3232_v50, 4 }
0x1a1c   : > { %v1728_v60 = vadd.f32 1e-05, %v1727_v58  ;;  %v3045_v61 = vsel %vm197_vm4, %v3044_v59, 0.0 }
0x1a1d   : > { %3046 = vadd.xlane.f32.xlu1 %v3045_v61 }
0x1a1e   : > { %5577 = vrsqrt.f32 %v1728_v60 }
0x1a28   : > { %v5578_v56 = vpop.eup %5577 }
0x1a29   : > { %v1730_v63 = vmul.f32 %v5578_v56, %v1722_v45 }
0x1a2b   : > { %v1736_v1 = vmul.f32 %v4907_v62, %v1730_v63 }
0x1a2d   : > { %v1742_v39 = vadd.f32 %v4908_v0, %v1736_v1 }
0x1a2e   : > { %3154 = vrot.lane.b32.xlu1 %v4940_v3, %s5676_s17 }
0x1a2f   : > { %5317 = vmatmul.mubr.msk.f32.vlgmr.msra.gmra.mrb[34].mxu1 %vm197_vm4, %v1742_v39 }
0x1a30   : > { %5326 = vmatprep.mubr.msk.f32.mxu1 %vm5673_vm3, %v5674_v5 }
0x1aaa   : > { %v3047_v6 = vpop.xlane.xlu1 %3046 }
0x1aab   : > { %v3048_v7 = vmul.f32 0.1, %v3047_v6 }
0x1aad   : > { %v3049_v8 = vadd.f32 1e-05, %v3048_v7 }
0x1aae   : > { %v3155_v16 = vpop.permute.xlu1 %3154 }
0x1aaf   : > { %5579 = vrsqrt.f32 %v3049_v8 }
0x1ab9   : > { %v5580_v10 = vpop.eup %5579 }
0x1aba   : > { %v3051_v13 = vmul.f32 %v5580_v10, %v3043_v57 }
0x1abc   : > { %v3057_v14 = vmul.f32 %v4938_v11, %v3051_v13 }
0x1abe   : > { %v6171_v15 = vadd.f32 %v4939_v22, %v3057_v14 }
0x1ac0   : > { %5310 = vmatmul.mubr.msk.f32.vlgmr.msra.gmra.mrb[34].mxu0 %vm197_vm4, %v6171_v15 }
0x1ac1   : > { %5321 = vmatprep.mubr.msk.f32.mxu0 %vm5673_vm3, %v5674_v5 }
0x1b02   : > { %v3228_v17 = vpop.f32.mrb[34].mxu1 }
0x1b03   : > { %v6177_v18 = vadd.f32 %v3228_v17, %v3155_v16  ;;  %v5318_v19 = vpop.f32.mrb[35].mxu1  ;;  %v4121_v16 = vrot.slane %v3232_v50, 6 }
0x1b05   : > { %3399 = vrot.lane.b32.xlu0 %v6177_v18, %s5675_s11  ;;  %5320 = vmatpush3.xpose.msk.msra.mxu0 %vm280_vm5, %v6177_v18 }
0x1b06   : > { %5329 = vmatprep.subr.mxu0 %v5674_v5 }
0x1b77   : > { %v3400_v24 = vpop.permute.xlu0 %3399 }
0x1b93   : > { %v3143_v20 = vpop.f32.mrb[34].mxu0 }
0x1b94   : > { %v6184_v21 = vadd.f32 %v4940_v3, %v3143_v20  ;;  %v5311_v23 = vpop.f32.mrb[35].mxu0 }
0x1b96   : > { %3397 = vrot.lane.b32.xlu0 %v6184_v21, %s5675_s11  ;;  %5322 = vmatmul.mubr.msk.f32.vlgmr.msra.gmra.mrb[36].mxu0 %vm280_vm5, %v6184_v21 }
0x1b97   : > { %5330 = vmatpush3.xpose.msk.msra.mxu0 %vm280_vm5, %v3400_v24  ;;  %5331 = vmatprep.mubr.msk.f32.mxu0 %vm5673_vm3, %v5674_v5 }
0x1b98   : > { %5339 = vmatprep.subr.mxu0 %v5674_v5 }
0x1c08   : > { %v3398_v35 = vpop.permute.xlu0 %3397 }
0x1c09   : > { %5332 = vmatmul.mubr.msk.f32.vlgmr.msra.gmra.mrb[38].mxu0 %vm280_vm5, %v3398_v35 }
0x1c0a   : > { %5341 = vmatprep.mubr.msk.f32.mxu0 %vm5673_vm3, %v5674_v5  ;;  %5340 = vmatpush3.msk.msra.mxu0 %vm201_vm0, %v3563_v51 }
0x1c0b   : > { %5349 = vmatprep.subr.mxu0 %v5674_v5 }
0x1c69   : > { %v3306_v25 = vpop.f32.mrb[36].mxu0 }
0x1c6a   : > { %v5323_v26 = vpop.f32.mrb[37].mxu0  ;;  %v3310_v27 = vsel %vm355_vm6, %v3306_v25, -inf }
0x1c6b   : > { %3311 = vmax.xlane.f32.xlu0 %v3310_v27 }
0x1cdc   : > { %v3471_v28 = vpop.f32.mrb[38].mxu0 }
0x1cdd   : > { %v5333_v29 = vpop.f32.mrb[39].mxu0  ;;  %v3475_v30 = vsel %vm355_vm6, %v3471_v28, -inf }
0x1cde   : > { %3476 = vmax.xlane.f32.xlu1 %v3475_v30 }
0x1cef   : > { %3486 = vrot.lane.b32.xlu1 %v6177_v18, %s5677_s19  ;;  %s5611_s19 = sshll.u32 %s5689_s16, 4  ;;  %s5612_s19 = int_to_ptr.vmem [resolvable:$false] %s5611_s19 }
0x1cf3   : > { %3714 = vrot.lane.b32.xlu1 %v6184_v21, %s5681_s26 }
0x1cf8   : > { %v3312_v31 = vpop.xlane.xlu0 %3311 }
0x1cf9   : > { %v3313_v32 = vsub.f32 %v3306_v25, %v3312_v31 }
0x1cfb   : > { %v3314_v34 = vmul.f32 1.442695, %v3313_v32 }
0x1cfd   : > { %5581 = vpow2.f32 %v3314_v34 }
0x1d07   : > { %v5582_v36 = vpop.eup %5581 }
0x1d08   : > { %v3316_v37 = vsel %vm355_vm6, %v5582_v36, 0.0 }
0x1d09   : > { %3317 = vadd.xlane.f32.xlu0 %v3316_v37 }
0x1d6b   : > { %v3477_v38 = vpop.xlane.xlu1 %3476 }
0x1d6c   : > { %v3478_v33 = vsub.f32 %v3471_v28, %v3477_v38 }
0x1d6e   : > { %v3479_v40 = vmul.f32 1.442695, %v3478_v33 }
0x1d6f   : > { %v3487_v12 = vpop.permute.xlu1 %3486 }
0x1d70   : > { %5583 = vpow2.f32 %v3479_v40 }
0x1d73   : > { %v3715_v58 = vpop.permute.xlu1 %3714 }
0x1d7a   : > { %v5584_v41 = vpop.eup %5583 }
0x1d7b   : > { %v3481_v42 = vsel %vm355_vm6, %v5584_v41, 0.0 }
0x1d7c   : > { %3482 = vadd.xlane.f32.xlu0 %v3481_v42 }
0x1d92   : > { %3321 = vrot.lane.b32.xlu0 %v6177_v18, %s5676_s17 }
0x1d96   : > { %3716 = vrot.lane.b32.xlu0 %v6177_v18, %s5681_s26  ;;  %v3318_v43 = vpop.xlane.xlu0 %3317 }
0x1d97   : > { %5585 = vrcp.f32 %v3318_v43 }
0x1da1   : > { %v5586_v45 = vpop.eup %5585 }
0x1da2   : > { %v3320_v46 = vmul.f32 %v5586_v45, %v5582_v36 }
0x1e09   : > { %v3483_v44 = vpop.xlane.xlu0 %3482 }
0x1e0a   : > { %5587 = vrcp.f32 %v3483_v44 }
0x1e0d   : > { %v3322_v47 = vpop.permute.xlu0 %3321 }
0x1e0e   : > { %5325 = vmatpush3.msra.mxu1 %v3322_v47 }
0x1e0f   : > { %5327 = vmatmul.mubr.msk.f32.vlgmr.msra.gmra.mrb[36].mxu1 %vm355_vm6, %v3320_v46  ;;  %5334 = vmatprep.subr.mxu1 %v5674_v5 }
0x1e10   : > { %5335 = vmatpush3.msra.mxu1 %v3487_v12  ;;  %5336 = vmatprep.mubr.msk.f32.mxu1 %vm5673_vm3, %v5674_v5 }
0x1e11   : > { %5344 = vmatprep.subr.mxu1 %v5674_v5  ;;  %v3717_v55 = vpop.permute.xlu0 %3716 }
0x1e14   : > { %v5588_v48 = vpop.eup %5587 }
0x1e15   : > { %v3485_v49 = vmul.f32 %v5588_v48, %v5584_v41 }
0x1e17   : > { %5337 = vmatmul.mubr.msk.f32.vlgmr.msra.gmra.mrb[38].mxu1 %vm355_vm6, %v3485_v49 }
0x1e18   : > { %5346 = vmatprep.mubr.msk.f32.mxu1 %vm5673_vm3, %v5674_v5  ;;  %5345 = vmatpush3.msk.msra.mxu1 %vm201_vm0, %v3232_v50  ;;  %v3233_v50 = vld [vmem:[%s6429_s2 + $0xa0] sm:$0x3] }
0x1e19   : > { %5354 = vmatprep.subr.mxu1 %v5674_v5 }
0x1ee2   : > { %v3393_v52 = vpop.f32.mrb[36].mxu1 }
0x1ee3   : > { %v5328_v53 = vpop.f32.mrb[37].mxu1  ;;  %5347 = vmatmul.mubr.msk.f32.vlgmr.msra.gmra.mrb[40].mxu1 %vm280_vm5, %v3393_v52 }
0x1ee4   : > { %5356 = vmatprep.mubr.msk.f32.mxu1 %vm5673_vm3, %v5674_v5 }
0x1eea   : > { %v3558_v54 = vpop.f32.mrb[38].mxu1 }
0x1eeb   : > { %v5338_v57 = vpop.f32.mrb[39].mxu1  ;;  %5342 = vmatmul.mubr.msk.f32.vlgmr.msra.gmra.mrb[40].mxu0 %vm280_vm5, %v3558_v54 }
0x1eec   : > { %5350 = vmatpush3.xpose.msk.msra.mxu0 %vm280_vm5, %v3717_v55  ;;  %5351 = vmatprep.mubr.msk.f32.mxu0 %vm5673_vm3, %v5674_v5 }
0x1eed   : > { %5359 = vmatprep.subr.mxu0 %v5674_v5 }
0x1eef   : > { %5352 = vmatmul.mubr.msk.f32.vlgmr.msra.gmra.mrb[42].mxu0 %vm280_vm5, %v3715_v58 }
0x1ef0   : > { %5360 = vmatpush3.msk.msra.mxu0 %vm201_vm0, %v3879_v9  ;;  %5361 = vmatprep.mubr.msk.f32.mxu0 %vm5673_vm3, %v5674_v5 }
0x1ef1   : > { %5369 = vmatprep.subr.mxu0 %v5674_v5 }
0x1fb6   : > { %v3710_v59 = vpop.f32.mrb[40].mxu1 }
0x1fb7   : > { %v5348_v60 = vpop.f32.mrb[41].mxu1 }
0x1fbe   : > { %v3635_v61 = vpop.f32.mrb[40].mxu0 }
0x1fbf   : > { %v3711_v56 = vadd.f32 %v3710_v59, %v3635_v61  ;;  %v5343_v62 = vpop.f32.mrb[41].mxu0  ;;  %v4970_v59 = vld [vmem:[%s6429_s2 + $0x10f] ss:$0 sm:$0xff] }
0x1fc2   : > { %v3788_v63 = vpop.f32.mrb[42].mxu0 }
0x1fc3   : > { %v5353_v0 = vpop.f32.mrb[43].mxu0  ;;  %v3792_v1 = vsel %vm355_vm6, %v3788_v63, -inf }
0x1fc4   : > { %3793 = vmax.xlane.f32.xlu0 %v3792_v1 }
0x1fda   : > { %3803 = vrot.lane.b32.xlu0 %v6177_v18, %s5680_s25  ;;  %s5613_s25 = scalar_lea.vmem %s5612_s19, 256 }
0x1fde   : > { %3956 = vrot.lane.b32.xlu0 %v6184_v21, %s5683_s30 }
0x2051   : > { %v3794_v3 = vpop.xlane.xlu0 %3793 }
0x2052   : > { %v3795_v39 = vsub.f32 %v3788_v63, %v3794_v3 }
0x2054   : > { %v3796_v6 = vmul.f32 1.442695, %v3795_v39 }
0x2055   : > { %v3804_v7 = vpop.permute.xlu0 %3803 }
0x2056   : > { %5589 = vpow2.f32 %v3796_v6  ;;  %5355 = vmatpush3.msra.mxu1 %v3804_v7  ;;  %v4472_v7 = vld [vmem:[%s6429_s2 + $0xa8] sm:$0xff] }
0x2057   : > { %5364 = vmatprep.subr.mxu1 %v5674_v5 }
0x2059   : > { %v3957_v17 = vpop.permute.xlu0 %3956 }
0x2060   : > { %v5590_v8 = vpop.eup %5589 }
0x2061   : > { %v3798_v10 = vsel %vm355_vm6, %v5590_v8, 0.0 }
0x2062   : > { %3799 = vadd.xlane.f32.xlu1 %v3798_v10 }
0x2073   : > { %3958 = vrot.lane.b32.xlu1 %v6177_v18, %s5683_s30 }
0x20ef   : > { %v3800_v11 = vpop.xlane.xlu1 %3799 }
0x20f0   : > { %5591 = vrcp.f32 %v3800_v11  ;;  %v4557_v11 = vld [vmem:[%s6429_s2 + $0xc0] sm:$0xff] }
0x20f3   : > { %v3959_v14 = vpop.permute.xlu1 %3958 }
0x20fa   : > { %v5592_v13 = vpop.eup %5591 }
0x20fb   : > { %v3802_v22 = vmul.f32 %v5592_v13, %v5590_v8  ;;  %v4473_v8 = vld [vmem:[%s6429_s2 + $0xb0] sm:$0x3]  ;;  %v4558_v13 = vld [vmem:[%s6429_s2 + $0xc8] sm:$0xff] }
0x20fc   : > { %v5455_v10 = vpack.c.bf16 %v4473_v8, %v4472_v7 }
0x20fd   : > { %5357 = vmatmul.mubr.msk.f32.vlgmr.msra.gmra.mrb[42].mxu1 %vm355_vm6, %v3802_v22 }
0x20fe   : > { %5365 = vmatpush3.xpose.msk.msra.mxu1 %vm280_vm5, %v3959_v14  ;;  %5366 = vmatprep.mubr.msk.f32.mxu1 %vm5673_vm3, %v5674_v5  ;;  %v4559_v14 = vld [vmem:[%s6429_s2 + $0xd0] sm:$0xff] }
0x20ff   : > { %5374 = vmatprep.subr.mxu1 %v5674_v5 }
0x2101   : > { %5367 = vmatmul.mubr.msk.f32.vlgmr.msra.gmra.mrb[44].mxu1 %vm280_vm5, %v3957_v17 }
0x2102   : > { %5375 = vmatpush3.msk.msra.mxu1 %vm201_vm0, %v4121_v16  ;;  %5376 = vmatprep.mubr.msk.f32.mxu1 %vm5673_vm3, %v5674_v5  ;;  %v5462_v16 = vpack.c.bf16 %v4559_v14, %v4558_v13 }
0x2103   : > { %5384 = vmatprep.subr.mxu1 %v5674_v5 }
0x21d0   : > { %v3875_v19 = vpop.f32.mrb[42].mxu1 }
0x21d1   : > { %v5358_v20 = vpop.f32.mrb[43].mxu1  ;;  %5362 = vmatmul.mubr.msk.f32.vlgmr.msra.gmra.mrb[44].mxu0 %vm280_vm5, %v3875_v19 }
0x21d2   : > { %5371 = vmatprep.mubr.msk.f32.mxu0 %vm5673_vm3, %v5674_v5 }
0x21d4   : > { %v4030_v23 = vpop.f32.mrb[44].mxu1 }
0x21d5   : > { %v5368_v24 = vpop.f32.mrb[45].mxu1  ;;  %v4034_v35 = vsel %vm355_vm6, %v4030_v23, -inf }
0x21d6   : > { %4035 = vmax.xlane.f32.xlu1 %v4034_v35  ;;  %v4971_v24 = vld [vmem:[%s6429_s2 + $0x110] ss:$0 sm:$0xff] }
0x21e7   : > { %4200 = vrot.lane.b32.xlu1 %v6177_v18, %s6442_s24 }
0x21eb   : > { %4198 = vrot.lane.b32.xlu1 %v6184_v21, %s6442_s24 }
0x2263   : > { %v4036_v25 = vpop.xlane.xlu1 %4035 }
0x2264   : > { %v4037_v26 = vsub.f32 %v4030_v23, %v4036_v25  ;;  %v4972_v25 = vld [vmem:[%s6429_s2 + $0x111] ss:$0 sm:$0xff] }
0x2266   : > { %v4038_v27 = vmul.f32 1.442695, %v4037_v26 }
0x2267   : > { %v4201_v37 = vpop.permute.xlu1 %4200 }
0x2268   : > { %5593 = vpow2.f32 %v4038_v27 }
0x226b   : > { %v4199_v33 = vpop.permute.xlu1 %4198 }
0x2272   : > { %v5594_v28 = vpop.eup %5593 }
0x2273   : > { %v4040_v29 = vsel %vm355_vm6, %v5594_v28, 0.0 }
0x2274   : > { %4041 = vadd.xlane.f32.xlu0 %v4040_v29 }
0x228a   : > { %4045 = vrot.lane.b32.xlu0 %v6177_v18, %s5682_s29 }
0x22a4   : > { %v3951_v30 = vpop.f32.mrb[44].mxu0 }
0x22a5   : > { %v3955_v31 = vadd.f32 %v3951_v30, %v3711_v56  ;;  %v5363_v32 = vpop.f32.mrb[45].mxu0  ;;  %v4562_v30 = vld [vmem:[%s6429_s2 + $0xe8] sm:$0x3] }
0x2301   : > { %v4042_v34 = vpop.xlane.xlu0 %4041 }
0x2302   : > { %5595 = vrcp.f32 %v4042_v34 }
0x2305   : > { %v4046_v36 = vpop.permute.xlu0 %4045 }
0x2306   : > { %5370 = vmatpush3.msra.mxu0 %v4046_v36 }
0x2307   : > { %5379 = vmatprep.subr.mxu0 %v5674_v5 }
0x230c   : > { %v5596_v21 = vpop.eup %5595 }
0x230d   : > { %v4044_v38 = vmul.f32 %v5596_v21, %v5594_v28  ;;  %v4561_v28 = vld [vmem:[%s6429_s2 + $0xe0] sm:$0xff] }
0x230f   : > { %5372 = vmatmul.mubr.msk.f32.vlgmr.msra.gmra.mrb[46].mxu0 %vm355_vm6, %v4044_v38 }
0x2310   : > { %5380 = vmatpush3.xpose.msk.msra.mxu0 %vm280_vm5, %v4201_v37  ;;  %5381 = vmatprep.mubr.msk.f32.mxu0 %vm5673_vm3, %v5674_v5 }
0x2311   : > { %5389 = vmatprep.subr.mxu0 %v5674_v5 }
0x2313   : > { %5382 = vmatmul.mubr.msk.f32.vlgmr.msra.gmra.mrb[48].mxu0 %vm280_vm5, %v4199_v33 }
0x2314   : > { %5391 = vmatprep.mubr.msk.f32.mxu0 %vm5673_vm3, %v5674_v5  ;;  %5390 = vmatpush3.msk.msra.mxu0 %vm201_vm0, %v3233_v50  ;;  %v4979_v50 = vld [vmem:[%s6429_s2 + $0x114] ss:$0 sm:$0xff] }
0x2315   : > { %5458 = vmatprep.subr.bf16.mxu0 %v5671_v2 }
0x23e2   : > { %v4117_v40 = vpop.f32.mrb[46].mxu0 }
0x23e3   : > { %v5373_v41 = vpop.f32.mrb[47].mxu0  ;;  %5377 = vmatmul.mubr.msk.f32.vlgmr.msra.gmra.mrb[46].mxu1 %vm280_vm5, %v4117_v40 }
0x23e4   : > { %5386 = vmatprep.mubr.msk.f32.mxu1 %vm5673_vm3, %v5674_v5 }
0x23e6   : > { %v4272_v42 = vpop.f32.mrb[48].mxu0 }
0x23e7   : > { %v5383_v43 = vpop.f32.mrb[49].mxu0  ;;  %v4276_v44 = vsel %vm355_vm6, %v4272_v42, -inf }
0x23e8   : > { %4277 = vmax.xlane.f32.xlu0 %v4276_v44 }
0x23fe   : > { %4287 = vrot.lane.b32.xlu0 %v6177_v18, %s6443_s4  ;;  %s170_s4 = sand.u32 1, %s5661_s13  }
0x23ff   : > { %s4865_s8 = sshll.u32 %s170_s4, 3  ;;  %s4780_s11 = scalar_lea.sflag [#allocation3], %s170_s4 }
0x2400   : > { %s172_s27 = scalar_lea.vmem [#allocation2], %s4865_s8 }
0x2401   : > { %s4793_s28 = sshll.u32 %s172_s27, 4  ;;  %s6386_s28 = int_to_ptr.vmem [resolvable:$true] %s4793_s28 }
0x2402   : > { %s5607_s17 = scalar_lea.vmem %s6386_s28, 128  ;;  %p5614_p0 = scmp.lt.s32.totalorder %s6386_s28, %s5612_s19 }
0x2403   : > { %p5608_p11 = scmp.ne.s32.totalorder %s6386_s28, %s5607_s17  ;;  %p5615_p1 = scmp.lt.s32.totalorder %s5613_s25, %s5607_s17 }
0x2405   : > { %p5609_p12 = pnand %p5608_p11, %p5748_p5  ;;  %p5616_p2 = por %p5615_p1, %p5614_p0 }
0x2407   : > { %p5610_p13 = pneg %p5609_p12 }
0x2409   : > { %p5617_p3 = pnand %p5616_p2, %p5610_p13 }
0x2475   : > { %v4278_v45 = vpop.xlane.xlu0 %4277 }
0x2476   : > { %v4279_v46 = vsub.f32 %v4272_v42, %v4278_v45 }
0x2478   : > { %v4280_v47 = vmul.f32 1.442695, %v4279_v46 }
0x2479   : > { %v4288_v12 = vpop.permute.xlu0 %4287 }
0x247a   : > { %5597 = vpow2.f32 %v4280_v47  ;;  %5385 = vmatpush3.msra.mxu1 %v4288_v12 }
0x247b   : > { %5454 = vmatprep.subr.bf16.mxu1 %v5671_v2 }
0x2484   : > { %v5598_v48 = vpop.eup %5597 }
0x2485   : > { %v4282_v49 = vsel %vm355_vm6, %v5598_v48, 0.0 }
0x2486   : > { %4283 = vadd.xlane.f32.xlu1 %v4282_v49 }
0x24b6   : > { %v4193_v18 = vpop.f32.mrb[46].mxu1 }
0x24b7   : > { %v4197_v51 = vadd.f32 %v4193_v18, %v3955_v31  ;;  %v5378_v52 = vpop.f32.mrb[47].mxu1  ;;  %v4973_v31 = vld [vmem:[%s6429_s2 + $0x112] ss:$0 sm:$0xff] }
0x2513   : > { %v4284_v53 = vpop.xlane.xlu1 %4283 }
0x2514   : > { %5599 = vrcp.f32 %v4284_v53 }
0x251e   : > { %v5600_v54 = vpop.eup %5599 }
0x251f   : > { %v4286_v55 = vmul.f32 %v5600_v54, %v5598_v48 }
0x2521   : > { %5387 = vmatmul.mubr.msk.f32.vlgmr.msra.gmra.mrb[48].mxu1 %vm355_vm6, %v4286_v55 }
0x2522   : > { %5398 = vmatprep.mubr.msk.f32.mxu1 %vm5673_vm3, %v5674_v5  ;;  %5457 = vmatpush3.bf16.msk.msra.mxu1 %vm5766_vm2, %v5455_v10 }
0x2523   : > { %5467 = vmatprep.subr.bf16.mxu1 %v5671_v2 }
0x25f4   : > { %v4359_v57 = vpop.f32.mrb[48].mxu1 }
0x25f5   : > { %v5388_v9 = vpop.f32.mrb[49].mxu1  ;;  %5392 = vmatmul.mubr.msk.f32.vlgmr.msra.gmra.mrb[50].mxu0 %vm280_vm5, %v4359_v57 }
0x25f6   : > { %5415 = vmatprep.mubr.msk.f32.mxu0 %vm5673_vm3, %v5674_v5 }
0x26c8   : > { %v4435_v58 = vpop.f32.mrb[50].mxu0 }
0x26c9   : > { %v4439_v60 = vadd.f32 %v4435_v58, %v4197_v51  ;;  %v5393_v61 = vpop.f32.mrb[51].mxu0  ;;  %v4980_v51 = vld [vmem:[%s6429_s2 + $0x115] ss:$0 sm:$0xff] }
0x26ca   : > { %v4696_v61 = vld [vmem:[%s6429_s2 + $0xf8] sm:$0x3] }
0x26cb   : > { %v4445_v56 = vadd.f32 %v4970_v59, %v4439_v60  ;;  %v4695_v60 = vld [vmem:[%s6429_s2 + $0xf0] sm:$0xff] }
0x26cd   : > { %v4446_v62 = vadd.f32 %v4445_v56, %v6171_v15  ;;  %v4556_v15 = vld [vmem:[%s6429_s2 + $0xb8] sm:$0xff]  ;;  %v5468_v56 = vpack.c.bf16 %v4696_v61, %v4695_v60 }
0x26ce   : > { %v5459_v22 = vpack.c.bf16 %v4557_v11, %v4556_v15 }
0x26cf   : > { %v4447_v63 = vsel %vm197_vm4, %v4446_v62, 0.0 }
0x26d0   : > { %4448 = vadd.xlane.f32.xlu1 %v4447_v63  ;;  %5460 = vmatpush3.bf16.msra.mxu0 %v5459_v22 }
0x26d1   : > { %5461 = vmatprep.subr.bf16.mxu0 %v5671_v2 }
0x26d4   : > { %5463 = vmatpush3.bf16.msra.mxu0 %v5462_v16 }
0x26d5   : > { %5464 = vmatprep.subr.bf16.mxu0 %v5671_v2  ;;  %v4560_v2 = vld [vmem:[%s6429_s2 + $0xd8] sm:$0xff] }
0x26d6   : > { %v5465_v29 = vpack.c.bf16 %v4561_v28, %v4560_v2 }
0x26d8   : > { %5466 = vmatpush3.bf16.msra.mxu0 %v5465_v29 }
0x26d9   : > { %5413 = vmatprep.subr.mxu0 %v5674_v5 }
0x26dc   : > { %5414 = vmatpush3.msk.msra.mxu0 %vm201_vm0, %v4562_v30 }
0x275d   : > { %v4449_v0 = vpop.xlane.xlu1 %4448 }
0x275e   : > { %v4450_v1 = vmul.f32 0.1, %v4449_v0 }
0x2760   : > { %v4451_v3 = vsub.f32 %v4446_v62, %v4450_v1 }
0x2762   : > { %v4452_v39 = vmul.f32 %v4451_v3, %v4451_v3 }
0x2764   : > { %v4453_v6 = vsel %vm197_vm4, %v4452_v39, 0.0 }
0x2765   : > { %4454 = vadd.xlane.f32.xlu1 %v4453_v6  ;;  %v4982_v6 = vld [vmem:[%s6429_s2 + $0x117] ss:$0 sm:$0xff] }
0x27f2   : > { %v4455_v17 = vpop.xlane.xlu1 %4454 }
0x27f3   : > { %v4456_v19 = vmul.f32 0.1, %v4455_v17 }
0x27f5   : > { %v4457_v20 = vadd.f32 1e-05, %v4456_v19 }
0x27f7   : > { %5601 = vrsqrt.f32 %v4457_v20 }
0x2801   : > { %v5602_v23 = vpop.eup %5601 }
0x2802   : > { %v4459_v35 = vmul.f32 %v5602_v23, %v4451_v3  ;;  %v4981_v3 = vld [vmem:[%s6429_s2 + $0x116] ss:$0 sm:$0xff] }
0x2804   : > { %v4465_v26 = vmul.f32 %v4971_v24, %v4459_v35 }
0x2806   : > { %v4471_v27 = vadd.f32 %v4972_v25, %v4465_v26 }
0x2808   : > { %5399 = vmatmul.mubr.msk.f32.vlgmr.msra.gmra.mrb[50].mxu1 %vm197_vm4, %v4471_v27 }
0x2809   : > { %5422 = vmatprep.mubr.msk.f32.mxu1 %vm5673_vm3, %v5674_v5  ;;  %v4976_v5 = vld [vmem:[%s6429_s2 + $0x113] ss:$0 sm:$0xff]  ;;  %5470 = vmatpush3.bf16.msk.msra.mxu1 %vm5766_vm2, %v5468_v56 }
0x28db   : > { %v4551_v32 = vpop.f32.mrb[50].mxu1 }
0x28dc   : > { %v4552_v34 = vadd.f32 %v4973_v31, %v4551_v32  ;;  %v5400_v36 = vpop.f32.mrb[51].mxu1 }
0x28de   : > { %v4555_v21 = vmax.f32 %v4552_v34, 0.0 }
0x28e0   : > { %5416 = vmatmul.mubr.msk.f32.vlgmr.msra.gmra.mrb[52].mxu0 %vm1615_vm7, %v4555_v21 }
0x29b3   : > { %v4640_v37 = vpop.f32.mrb[52].mxu0 }
0x29b4   : > { %v4641_v38 = vadd.f32 %v4976_v5, %v4640_v37  ;;  %v5417_v33 = vpop.f32.mrb[53].mxu0 }
0x29b6   : > { %v4644_v40 = vadd.f32 %v4641_v38, %v4471_v27 }
0x29b8   : > { %v4645_v41 = vsel %vm197_vm4, %v4644_v40, 0.0 }
0x29b9   : > { %4646 = vadd.xlane.f32.xlu1 %v4645_v41 }
0x2a46   : > { %v4647_v42 = vpop.xlane.xlu1 %4646 }
0x2a47   : > { %v4648_v43 = vmul.f32 0.1, %v4647_v42 }
0x2a49   : > { %v4649_v44 = vsub.f32 %v4644_v40, %v4648_v43 }
0x2a4b   : > { %v4650_v45 = vmul.f32 %v4649_v44, %v4649_v44 }
0x2a4d   : > { %v4651_v46 = vsel %vm197_vm4, %v4650_v45, 0.0 }
0x2a4e   : > { %4652 = vadd.xlane.f32.xlu1 %v4651_v46 }
0x2adb   : > { %v4653_v47 = vpop.xlane.xlu1 %4652 }
0x2adc   : > { %v4654_v12 = vmul.f32 0.1, %v4653_v47 }
0x2ade   : > { %v4655_v48 = vadd.f32 1e-05, %v4654_v12 }
0x2ae0   : > { %5603 = vrsqrt.f32 %v4655_v48 }
0x2aea   : > { %v5604_v49 = vpop.eup %5603 }
0x2aeb   : > { %v4657_v18 = vmul.f32 %v5604_v49, %v4649_v44 }
0x2aed   : > { %v4663_v52 = vmul.f32 %v4979_v50, %v4657_v18 }
0x2aef   : > { %v4669_v53 = vadd.f32 %v4980_v51, %v4663_v52 }
0x2af1   : > { %v4670_v54 = vsel %vm197_vm4, %v4669_v53, 0.0 }
0x2af2   : > { %4671 = vadd.xlane.f32.xlu1 %v4670_v54 }
0x2b7f   : > { %v4672_v55 = vpop.xlane.xlu1 %4671 }
0x2b80   : > { %v4673_v57 = vmul.f32 0.1, %v4672_v55 }
0x2b82   : > { %v4674_v9 = vsub.f32 %v4669_v53, %v4673_v57 }
0x2b84   : > { %v4675_v58 = vmul.f32 %v4674_v9, %v4674_v9 }
0x2b86   : > { %v4676_v59 = vsel %vm197_vm4, %v4675_v58, 0.0 }
0x2b87   : > { %4677 = vadd.xlane.f32.xlu0 %v4676_v59 }
0x2c14   : > { %v4678_v62 = vpop.xlane.xlu0 %4677 }
0x2c15   : > { %v4679_v63 = vmul.f32 0.1, %v4678_v62 }
0x2c17   : > { %v4680_v0 = vadd.f32 1e-05, %v4679_v63 }
0x2c19   : > { %5605 = vrsqrt.f32 %v4680_v0 }
0x2c23   : > { %v5606_v1 = vpop.eup %5605 }
0x2c24   : > { %v4682_v39 = vmul.f32 %v5606_v1, %v4674_v9 }
0x2c26   : > { %v4688_v7 = vmul.f32 %v4981_v3, %v4682_v39 }
0x2c28   : > { %v4694_v8 = vadd.f32 %v4982_v6, %v4688_v7 }
0x2c2a   : > { %5423 = vmatmul.mubr.msk.f32.vlgmr.msra.gmra.mrb[52].mxu1 %vm197_vm4, %v4694_v8 }
0x2cfd   : > { %v4774_v10 = vpop.f32.mrb[52].mxu1 }
0x2cfe   : > { %v4775_v15 = vadd.f32 %v4983_v4, %v4774_v10  ;;  %v5424_v11 = vpop.f32.mrb[53].mxu1 }
0x2d00   : > { %4778 = vst.msk [vmem:[%s172_s27] sm:$0xff] %vm197_vm4, %v4775_v15 }
0x2d01   : > { %5620 = shalt.err (!%p5617_p3)
}
0x2d02   : > { %s5621_s26 = scalar_lea.hbm %s6384_s7, 128  ;;  %s5625_s24 = scalar_lea.hbm %s6430_s3, 256 }
0x2d03   : > { %p5622_p4 = scmp.ne.s32.totalorder %s6384_s7, %s5621_s26  ;;  %p5626_p9 = scmp.lt.u32.totalorder %s6384_s7, %s6430_s3 }
0x2d04   : > { %p5627_p10 = scmp.lt.u32.totalorder %s5625_s24, %s5621_s26  ;;  %p5629_p12 = scmp.lt.u32.totalorder %s5621_s26, %s6384_s7 }
0x2d05   : > { %p5623_p7 = pnand %p5622_p4, %p5748_p5 }
0x2d06   : > { %p5628_p11 = por %p5627_p10, %p5626_p9 }
0x2d07   : > { %p5624_p8 = pneg %p5623_p7 }
0x2d08   : > { %p5630_p13 = por %p5629_p12, %p5628_p11 }
0x2d0a   : > { %p5631_p0 = pnand %p5630_p13, %p5624_p8 }
0x2d0c   : > { %5634 = shalt.err (!%p5631_p0)
}
0x2d0d   : > { %5471 = dma.vmem_to_hbm [thread:$0]  (%p5748_p5), %s6386_s28, 128, %s6384_s7, %s4780_s11  }
0x2d0e PF: > { %p5477_p1 = scmp.ge.s32.totalorder %s5669_s15, 2  ;;  %s4805_s20 = sand.u32 1, %s5657_s12  }
0x2d0f   : > { %s4806_s9 = scalar_lea.sflag [#allocation3], %s4805_s20 }
0x2d10   : > { %p5474_p2 = pnand %p5477_p1, %p5752_p6 }
0x2d12   : > { %5652 = dma.done.wait (!%p5474_p2), %s4806_s9, 128  }
0x2d13   : > { %5654 = vsyncadd (!%p5474_p2), %s4806_s9, 4294967168  ;;  %p13_p3 = scmp.ge.s32.totalorder %s5735_s18, 4   ;;  %s6445_s12 = smov %s5661_s13 }
0x2d14   : > { %s6446_s13 = smov %s5665_s14  ;;  %s6447_s14 = smov %s5746_s21 }
0x2d15   : > { %s6448_s15 = smov %s5735_s18  ;;  %15 = sbr.rel (!%p13_p3) target bundleno = 3 (0x3), region = 70 }
0x2d1c   :  { %4811 = vsyncpa [#allocation3], 1 }
0x2d1d   :  { %4813 = vsyncpa [#allocation3 + $0x1], 1 }

</bundles_post_ra>
